<compile_context>
chip_gen: v7x
topology: tpu7x:2x2x1
jax: 0.10.0
libtpu: 0.0.40
codegen_flags: <defaults>
</compile_context>

<pallas_src>
import functools

import jax
import jax.numpy as jnp
import numpy as np
from jax.experimental import pallas as pl
from jax.experimental.pallas import tpu as pltpu


# ----------------------------------------------------------------------------
# small helpers
# ----------------------------------------------------------------------------
def _cdiv(a, b):
    return -(-a // b)


def _round_up(x, m):
    return _cdiv(x, m) * m


def _pad2(a, rows, cols):
    pr, pc = rows - a.shape[0], cols - a.shape[1]
    if pr == 0 and pc == 0:
        return a
    return jnp.pad(a, ((0, pr), (0, pc)))


def _tpu_generation():
    kind = jax.devices()[0].device_kind.lower()
    if "v5 lite" in kind or "v5e" in kind or "v5lite" in kind:
        return "v5e"
    if "v6" in kind:
        return "v6e"
    if "v7" in kind:
        return "v7x"
    return "unknown"


# generation -> (vmem budget bytes, row-tile target, bf16 elementwise ok)
_GEN_CONFIG = {
    "v5e":     (100 * 2**20, 320, False),   # 128 MiB VMEM, no bf16 VPU/EUP
    "v6e":     (100 * 2**20, 1024, True),   # 128 MiB VMEM, ridge ~650 FLOP/B
    "v7x":     (56 * 2**20, 512, True),     # 64 MiB VMEM, keep >=2 row tiles
    "unknown": (56 * 2**20, 256, False),    # conservative: runs anywhere
}


# ----------------------------------------------------------------------------
# one-time parameter preparation (hoisted out of the per-call path)
# ----------------------------------------------------------------------------
def prepare_connector_params(w1, b1, w2, b2, *, compute_dtype=jnp.bfloat16,
                             generation=None):
    """Pad + cast the connector weights once; reuse the result every forward."""
    gen = generation if generation is not None else _tpu_generation()
    budget, _, _ = _GEN_CONFIG[gen]

    Dv, Dh = w1.shape
    assert w2.shape[0] == Dh
    Do = w2.shape[1]
    csz = jnp.dtype(compute_dtype).itemsize

    # Lane-dense feature dims (multiples of 128).
    Dv_pad = _round_up(Dv, 128)
    Dh_pad = _round_up(Dh, 128)
    Do_pad = _round_up(Do, 128)

    # VMEM cost of the weight blocks (the pipeline double-buffers every block;
    # constant-index blocks are not re-DMA'd, only the extra copy is paid).
    def weight_bytes(tn_):
        return (2 * Dv_pad * Dh_pad * csz + 2 * Dh_pad * 4
                + 2 * Dh_pad * tn_ * csz + 2 * tn_ * 4)

    # Resident W2 (tn = Do_pad): W2 streams from HBM exactly once per call and
    # the j grid axis collapses to 1.  Only taken when it leaves >= half the
    # budget for activation tiles; otherwise stream wide column tiles.
    if weight_bytes(Do_pad) <= budget // 2:
        tn = Do_pad
    else:
        tn = min(1024, Do_pad)
        while tn > 256 and weight_bytes(tn) > budget // 2:
            tn //= 2
        Do_pad = _round_up(Do_pad, tn)

    # Zero padding is mathematically inert: padded x cols hit zero W1 rows,
    # padded W1 cols / b1 give GELU(0)=0 hidden cols hitting zero W2 rows,
    # padded output rows/cols are sliced off in connector_forward.
    return dict(
        w1=_pad2(jnp.asarray(w1, compute_dtype), Dv_pad, Dh_pad),
        b1=_pad2(jnp.asarray(b1, jnp.float32).reshape(1, Dh), 1, Dh_pad),
        w2=_pad2(jnp.asarray(w2, compute_dtype), Dh_pad, Do_pad),
        b2=_pad2(jnp.asarray(b2, jnp.float32).reshape(1, Do), 1, Do_pad),
        dims=(Dv, Dh, Do),
        tn=tn,
        compute_dtype=compute_dtype,
        generation=gen,
    )


# ----------------------------------------------------------------------------
# kernel
# ----------------------------------------------------------------------------
def _connector_mlp_kernel(x_ref, w1_ref, b1_ref, w2_ref, b2_ref, o_ref, h_ref,
                          *, act_dtype):
    """o[i, j] = GELU(x[i] @ W1 + b1) @ W2[:, j] + b2[j].

    The hidden tile depends only on the row-tile index i, so it is computed
    once (at j == 0) and cached in the VMEM scratch `h_ref` for every W2 column
    tile.  INVARIANT: j must remain the innermost, sequentially-executed grid
    axis ("arbitrary"); never mark it "parallel" or reorder the grid axes, or
    the cache becomes stale.
    """
    j = pl.program_id(1)

    @pl.when(j == 0)
    def _():
        # bf16 x bf16 -> f32 accumulation on the MXU.
        acc = jnp.dot(x_ref[...], w1_ref[...],
                      preferred_element_type=jnp.float32)
        # Bias add + outer GELU multiplies in act_dtype (bf16 on v6e/v7x halves
        # the VPU element width; f32 on v5e which has no bf16 VPU).  The erf
        # itself stays in f32: exact torch.nn.GELU(default) semantics and safe
        # lowering on every TPU generation.
        h = acc.astype(act_dtype) + b1_ref[...].astype(act_dtype)
        g = jax.lax.erf(h.astype(jnp.float32) * np.float32(1.0 / np.sqrt(2.0)))
        h = h * (0.5 * (1.0 + g)).astype(act_dtype)
        h_ref[...] = h.astype(h_ref.dtype)

    # Second matmul on the cached hidden tile against this W2 column tile.
    o = jnp.dot(h_ref[...], w2_ref[...], preferred_element_type=jnp.float32)
    o = o + b2_ref[...]
    o_ref[...] = o.astype(o_ref.dtype)


# ----------------------------------------------------------------------------
# forward wrapper
# ----------------------------------------------------------------------------
def connector_forward(x, params, *, tm=None, out_dtype=None):
    """x: (B, S, D_vis) -> (B, S, D_out) using the prepared connector params.

    Pass out_dtype=jnp.bfloat16 when the downstream LLM consumes bf16 (halves
    output HBM writeback and the double-buffered output tile in VMEM).
    """
    B, S, _ = x.shape
    Dv, Dh, Do = params["dims"]
    w1p, b1p, w2p, b2p = params["w1"], params["b1"], params["w2"], params["b2"]
    Dv_pad, Dh_pad = w1p.shape
    Do_pad = w2p.shape[1]
    tn = params["tn"]
    compute_dtype = params["compute_dtype"]
    gen = params["generation"]
    budget, tm_target, bf16_elementwise = _GEN_CONFIG[gen]
    act_dtype = jnp.bfloat16 if bf16_elementwise else jnp.float32
    out_dtype = out_dtype if out_dtype is not None else x.dtype

    M = B * S
    csz = jnp.dtype(compute_dtype).itemsize
    osz = jnp.dtype(out_dtype).itemsize

    def vmem_bytes(tm_):
        return (2 * tm_ * Dv_pad * csz        # x row tile (double-buffered)
                + 2 * Dv_pad * Dh_pad * csz   # W1 (constant index: 1 DMA, 2 copies)
                + 2 * Dh_pad * 4              # b1
                + 2 * Dh_pad * tn * csz       # W2 column tile
                + 2 * tn * 4                  # b2
                + 2 * tm_ * tn * osz          # output tile
                + tm_ * Dh_pad * csz)         # hidden scratch

    # Row tile: divide M tightly (no padded-row MXU flops), sublane aligned,
    # sized near the generation's roofline-ridge target, shrunk only if the
    # VMEM budget demands it.  On v7x keep >= 2 row tiles for megacore.
    if tm is None:
        n_tiles = max(1, _cdiv(M, tm_target))
        if gen == "v7x" and M >= 16:
            n_tiles = max(2, n_tiles)
        tm = _round_up(_cdiv(M, n_tiles), 8)
        while vmem_bytes(tm) > budget and tm > 8:
            n_tiles *= 2
            tm = _round_up(_cdiv(M, n_tiles), 8)
    else:
        tm = _round_up(tm, 8)
    M_pad = _round_up(M, tm)
    grid = (M_pad // tm, Do_pad // tn)
    n_i, n_j = grid

    # Per-call x prep only; skip the pad entirely when already aligned.
    x2 = jnp.asarray(x.reshape(M, Dv), compute_dtype)
    if (M_pad, Dv_pad) != (M, Dv):
        x2 = _pad2(x2, M_pad, Dv_pad)

    # Honest HBM traffic: constant-index blocks (W1, b1; W2/b2 when resident)
    # are fetched once; a streamed W2 is re-read once per row tile.
    w2_reads = 1 if n_j == 1 else n_i
    cost = pl.CostEstimate(
        flops=2 * M_pad * (Dv_pad * Dh_pad + Dh_pad * Do_pad),
        transcendentals=M_pad * Dh_pad,
        bytes_accessed=int(
            M_pad * Dv_pad * csz
            + Dv_pad * Dh_pad * csz
            + w2_reads * Dh_pad * Do_pad * csz
            + Dh_pad * 4 + Do_pad * 4
            + M_pad * Do_pad * osz),
    )

    vmem_limit = int(min(budget, max(32 * 2**20, vmem_bytes(tm) + (4 << 20))))

    grid_spec = pltpu.PrefetchScalarGridSpec(
        num_scalar_prefetch=0,
        grid=grid,
        in_specs=[
            pl.BlockSpec((tm, Dv_pad), lambda i, j: (i, 0)),      # x row tile
            pl.BlockSpec((Dv_pad, Dh_pad), lambda i, j: (0, 0)),  # W1 (resident)
            pl.BlockSpec((1, Dh_pad), lambda i, j: (0, 0)),       # b1 (resident)
            pl.BlockSpec((Dh_pad, tn), lambda i, j: (0, j)),      # W2 column tile
            pl.BlockSpec((1, tn), lambda i, j: (0, j)),           # b2 column tile
        ],
        out_specs=pl.BlockSpec((tm, tn), lambda i, j: (i, j)),
        scratch_shapes=[pltpu.VMEM((tm, Dh_pad), compute_dtype)],
    )

    kernel = functools.partial(_connector_mlp_kernel, act_dtype=act_dtype)
    out_pad = pl.pallas_call(
        kernel,
        out_shape=jax.ShapeDtypeStruct((M_pad, Do_pad), out_dtype),
        grid_spec=grid_spec,
        compiler_params=pltpu.CompilerParams(
            # i is independent across row tiles ("parallel", megacore-shardable);
            # j MUST stay "arbitrary" (sequential, innermost) -- the hidden-tile
            # cache in VMEM scratch depends on it.
            dimension_semantics=("parallel", "arbitrary"),
            vmem_limit_bytes=vmem_limit,
        ),
        cost_estimate=cost,
    )(x2, w1p, b1p, w2p, b2p)

    return out_pad[:M, :Do].reshape(B, S, Do)


def _reference_forward(x, w1, b1, w2, b2):
    h = jax.nn.gelu(jnp.einsum("bsd,dh->bsh", x, w1) + b1, approximate=False)
    return jnp.einsum("bsh,ho->bso", h, w2) + b2


if __name__ == "__main__":
    # TODO(synk): the base Connector defers the module choice to a config and
    # loads frozen weights from a checkpoint; the standard LLaVA "mlp2x_gelu"
    # projector (Linear-GELU-Linear) with synthetic weights is implemented here.
    # Small, deliberately non-128-aligned shapes exercise the padding paths.
    B, S, D_VIS, D_HID, D_OUT = 2, 200, 96, 256, 192

    key = jax.random.PRNGKey(0)
    kx, k1, k2, k3, k4 = jax.random.split(key, 5)

    x = jax.random.normal(kx, (B, S, D_VIS), dtype=jnp.float32)
    w1 = jax.random.normal(k1, (D_VIS, D_HID), dtype=jnp.float32) * 0.02
    b1 = jax.random.normal(k2, (D_HID,), dtype=jnp.float32) * 0.02
    w2 = jax.random.normal(k3, (D_HID, D_OUT), dtype=jnp.float32) * 0.02
    b2 = jax.random.normal(k4, (D_OUT,), dtype=jnp.float32) * 0.02

    # One-time weight prep (pad + bf16 cast hoisted out of the forward path).
    params = prepare_connector_params(w1, b1, w2, b2)

    out = connector_forward(x, params)
    out = jax.block_until_ready(out)

    ref = _reference_forward(x, w1, b1, w2, b2)
    assert out.shape == (B, S, D_OUT)
    # bf16 inputs/weights with f32 accumulation: loose tolerance vs f32 ref.
    assert jnp.allclose(out, ref, atol=2e-2, rtol=2e-2), "mismatch vs reference"

    print("KERNEL_OK")
</pallas_src>

<mosaic_0001>
module attributes {stable_mosaic.version = 11 : i64} {
  func.func @_connector_mlp_kernel(%arg0: i32, %arg1: i32, %arg2: memref<200x128xbf16, #tpu.memory_space<vmem>>, %arg3: memref<128x256xbf16, #tpu.memory_space<vmem>>, %arg4: memref<1x256xf32, #tpu.memory_space<vmem>>, %arg5: memref<256x256xbf16, #tpu.memory_space<vmem>>, %arg6: memref<1x256xf32, #tpu.memory_space<vmem>>, %arg7: memref<200x256xf32, #tpu.memory_space<vmem>>, %arg8: memref<200x256xbf16, #tpu.memory_space<vmem>>) attributes {dimension_semantics = [#tpu.dimension_semantics<parallel>, #tpu.dimension_semantics<arbitrary>], iteration_bounds = array<i64: 2, 1>, scalar_prefetch = 0 : i64, scratch_operands = 1 : i64, tpu.core_type = #tpu.core_type<tc>, window_params = [{transform_indices = @transform_0, window_bounds = array<i64: 200, 128>}, {pipeline_mode = #tpu.pipeline_mode<synchronous>, transform_indices = @transform_1, window_bounds = array<i64: 128, 256>}, {pipeline_mode = #tpu.pipeline_mode<synchronous>, transform_indices = @transform_2, window_bounds = array<i64: 1, 256>}, {transform_indices = @transform_3, window_bounds = array<i64: 256, 256>}, {transform_indices = @transform_4, window_bounds = array<i64: 1, 256>}, {transform_indices = @transform_5, window_bounds = array<i64: 200, 256>}]} {
    %c0_i32 = arith.constant 0 : i32
    %0 = arith.cmpi eq, %arg1, %c0_i32 : i32
    %1 = arith.extui %0 : i1 to i32
    %c0_i32_0 = arith.constant 0 : i32
    %2 = arith.cmpi ne, %1, %c0_i32_0 : i32
    scf.if %2 {
      %c0_8 = arith.constant 0 : index
      %c0_9 = arith.constant 0 : index
      %10 = vector.load %arg2[%c0_8, %c0_9] : memref<200x128xbf16, #tpu.memory_space<vmem>>, vector<200x128xbf16>
      %c0_10 = arith.constant 0 : index
      %c0_11 = arith.constant 0 : index
      %11 = vector.load %arg3[%c0_10, %c0_11] : memref<128x256xbf16, #tpu.memory_space<vmem>>, vector<128x256xbf16>
      %cst_12 = arith.constant dense<0.000000e+00> : vector<200x256xf32>
      %12 = tpu.matmul %10, %11, %cst_12 {dimension_numbers = #tpu.dot_dimension_numbers<[1], [0], [0], [1], [0, 0, 1, 1], [], []>} : vector<200x128xbf16>, vector<128x256xbf16>, vector<200x256xf32> -> vector<200x256xf32>
      %c0_13 = arith.constant 0 : index
      %c0_14 = arith.constant 0 : index
      %13 = vector.load %arg4[%c0_13, %c0_14] : memref<1x256xf32, #tpu.memory_space<vmem>>, vector<1x256xf32>
      %14 = vector.broadcast %13 : vector<1x256xf32> to vector<200x256xf32>
      %15 = arith.addf %12, %14 : vector<200x256xf32>
      %cst_15 = arith.constant 0.707106769 : f32
      %16 = vector.broadcast %cst_15 : f32 to vector<200x256xf32>
      %17 = arith.mulf %15, %16 : vector<200x256xf32>
      %18 = math.erf %17 : vector<200x256xf32>
      %cst_16 = arith.constant 1.000000e+00 : f32
      %19 = vector.broadcast %cst_16 : f32 to vector<200x256xf32>
      %20 = arith.addf %19, %18 : vector<200x256xf32>
      %cst_17 = arith.constant 5.000000e-01 : f32
      %21 = vector.broadcast %cst_17 : f32 to vector<200x256xf32>
      %22 = arith.mulf %21, %20 : vector<200x256xf32>
      %23 = arith.mulf %15, %22 : vector<200x256xf32>
      %24 = arith.truncf %23 : vector<200x256xf32> to vector<200x256xbf16>
      %c0_18 = arith.constant 0 : index
      %c0_19 = arith.constant 0 : index
      %25 = vector.load %arg8[%c0_18, %c0_19] : memref<200x256xbf16, #tpu.memory_space<vmem>>, vector<200x256xbf16>
      tpu.vector_store %arg8[%c0_18, %c0_19], %24 {strides = array<i32>} : memref<200x256xbf16, #tpu.memory_space<vmem>>, vector<200x256xbf16>,
    } else {
    }
    %c0 = arith.constant 0 : index
    %c0_1 = arith.constant 0 : index
    %3 = vector.load %arg8[%c0, %c0_1] : memref<200x256xbf16, #tpu.memory_space<vmem>>, vector<200x256xbf16>
    %c0_2 = arith.constant 0 : index
    %c0_3 = arith.constant 0 : index
    %4 = vector.load %arg5[%c0_2, %c0_3] : memref<256x256xbf16, #tpu.memory_space<vmem>>, vector<256x256xbf16>
    %cst = arith.constant dense<0.000000e+00> : vector<200x256xf32>
    %5 = tpu.matmul %3, %4, %cst {dimension_numbers = #tpu.dot_dimension_numbers<[1], [0], [0], [1], [0, 0, 1, 1], [], []>} : vector<200x256xbf16>, vector<256x256xbf16>, vector<200x256xf32> -> vector<200x256xf32>
    %c0_4 = arith.constant 0 : index
    %c0_5 = arith.constant 0 : index
    %6 = vector.load %arg6[%c0_4, %c0_5] : memref<1x256xf32, #tpu.memory_space<vmem>>, vector<1x256xf32>
    %7 = vector.broadcast %6 : vector<1x256xf32> to vector<200x256xf32>
    %8 = arith.addf %5, %7 : vector<200x256xf32>
    %c0_6 = arith.constant 0 : index
    %c0_7 = arith.constant 0 : index
    %9 = vector.load %arg7[%c0_6, %c0_7] : memref<200x256xf32, #tpu.memory_space<vmem>>, vector<200x256xf32>
    tpu.vector_store %arg7[%c0_6, %c0_7], %8 {strides = array<i32>} : memref<200x256xf32, #tpu.memory_space<vmem>>, vector<200x256xf32>,
    return
  }
  func.func @transform_0(%arg0: i32, %arg1: i32) -> (i32, i32) {
    %c0_i32 = arith.constant 0 : i32
    %c0_i32_0 = arith.constant 0 : i32
    return %arg0, %c0_i32 : i32, i32
  }
  func.func @transform_1(%arg0: i32, %arg1: i32) -> (i32, i32) {
    %c0_i32 = arith.constant 0 : i32
    %c0_i32_0 = arith.constant 0 : i32
    %c0_i32_1 = arith.constant 0 : i32
    return %c0_i32, %c0_i32_0 : i32, i32
  }
  func.func @transform_2(%arg0: i32, %arg1: i32) -> (i32, i32) {
    %c0_i32 = arith.constant 0 : i32
    %c0_i32_0 = arith.constant 0 : i32
    %c0_i32_1 = arith.constant 0 : i32
    return %c0_i32, %c0_i32_0 : i32, i32
  }
  func.func @transform_3(%arg0: i32, %arg1: i32) -> (i32, i32) {
    %c0_i32 = arith.constant 0 : i32
    %c0_i32_0 = arith.constant 0 : i32
    return %c0_i32, %arg1 : i32, i32
  }
  func.func @transform_4(%arg0: i32, %arg1: i32) -> (i32, i32) {
    %c0_i32 = arith.constant 0 : i32
    %c0_i32_0 = arith.constant 0 : i32
    return %c0_i32, %arg1 : i32, i32
  }
  func.func @transform_5(%arg0: i32, %arg1: i32) -> (i32, i32) {
    %c0_i32 = arith.constant 0 : i32
    return %arg0, %arg1 : i32, i32
  }
}

</mosaic_0001>

<bundles_post_ra>
// kernel: tpu_custom_call.1
= control target key start
LH: loop header
LB: loop body
LE: loop exit
PB: predicated region body
PF: predicated region fallthrough
CT: control target
= control target key end

     0   :  { %10 = vsyncpa [#allocation4], 0  ;;  %s3164_s0 = inlined_call_operand.hbm [shape: bf16[400,128], index: 0, kind: input, shape index: {}]   ;;  %s3165_s1 = inlined_call_operand.hbm [shape: bf16[128,256], index: 1, kind: input, shape index: {}]   ;;  %s3166_s2 = inlined_call_operand.vmem [shape: f32[1,256], index: 2, kind: input, shape index: {}]   ;;  %s3167_s3 = inlined_call_operand.hbm [shape: bf16[256,256], index: 3, kind: input, shape index: {}]   ;;  %s3168_s4 = inlined_call_operand.vmem [shape: f32[1,256], index: 4, kind: input, shape index: {}]   ;;  %s3169_s5 = inlined_call_operand.hbm [shape: f32[400,256], index: 5, kind: output, shape index: {}]  }
   0x1   :  { %12 = vsyncpa [#allocation4 + $0x1], 0 }
   0x2   :  { %13 = vsyncpa [#allocation7], 0 }
   0x3   :  { %14 = vsyncpa [#allocation5], 0 }
   0x4   :  { %16 = vsyncpa [#allocation5 + $0x1], 0  ;;  %s2527_s18 = smov 0   ;;  %s2529_s19 = smov 0  }
   0x5   :  { %s2531_s20 = smov 0   ;;  %s2533_s21 = smov 0  }
   0x6   :  { %s2535_s22 = smov 0   ;;  %s2537_s23 = smov 0  }
   0x7 LB: > { %s1820_s24 = sadd.s32 4294967295, %s2484_s23   ;;  %s1821_s25 = sadd.s32 4294967294, %s2484_s23   ;;  %s2484_s23 = sphi %s2537_s23, %s22_s23   ;;  %s2480_s22 = sphi %s2535_s22, %s3191_s22   ;;  %s2476_s21 = sphi %s2533_s21, %s3190_s21   ;;  %s2472_s20 = sphi %s2531_s20, %s3189_s20   ;;  %s2468_s19 = sphi %s2529_s19, %s3188_s19   ;;  %s2464_s18 = sphi %s2527_s18, %s3187_s18  }
   0x8   : > { %p54_p0 = scmp.ne.s32.totalorder %s2468_s19, %s2464_s18  ;;  %p2561_p1 = scmp.eq.s32.totalorder %s1820_s24, 0 }
   0x9   : > { %p2565_p2 = scmp.eq.s32.totalorder %s1820_s24, 1  ;;  %p180_p3 = scmp.eq.s32.totalorder %s1821_s25, 1 }
   0xa   : > { %s3174_s26 = scalar_select %p2561_p1, 1, 0 }
   0xb   : > { %p2571_p4 = por %p2561_p1, %p54_p0  ;;  %p1822_p5 = scmp.ge.s32.totalorder %s2484_s23, 1 }
   0xc   : > { %p2576_p6 = por %p180_p3, %p54_p0  ;;  %p187_p7 = scmp.lt.s32.totalorder %s2484_s23, 3 }
   0xd   : > { %s3176_s28 = scalar_select %p2571_p4, 1, 0 }
   0xe   : > { %s3177_s29 = scalar_select %p2576_p6, 1, 0 }
   0xf   : > { %p2581_p8 = pnand %p1822_p5, %p187_p7  ;;  %s2486_s6 = smov [#allocation6]  }
  0x10   : > { %s199_s7 = sshll.u32 %s2486_s6, 4  ;;  %s2487_s9 = smov [#allocation8]   ;;  %s2585_s7 = int_to_ptr.vmem [resolvable:$true] %s199_s7 }
  0x11   : > { %p2049_p9 = pneg %p2581_p8  ;;  %s218_s10 = sshll.u32 %s2487_s9, 4  ;;  %s2596_s10 = int_to_ptr.vmem [resolvable:$true] %s218_s10 }
  0x12   : > { %s2312_s13 = scalar_lea.hbm %s3165_s1, 2048 }
  0x13   : > { %p2592_p11 = pnand %p2049_p9, %p2561_p1  ;;  %p2313_p12 = scmp.ne.s32.totalorder %s3165_s1, %s2312_s13 }
  0x14   : > { %p2319_p5 = scmp.lt.u32.totalorder %s2312_s13, %s3165_s1 }
  0x15   : > { %p2314_p13 = pneg %p2592_p11 }
  0x17   : > { %p2315_p0 = pnand %p2314_p13, %p2313_p12 }
  0x19   : > { %p2316_p3 = pneg %p2315_p0 }
  0x1b   : > { %p2321_p7 = pnand %p2319_p5, %p2316_p3 }
  0x1d   : > { %2324 = shalt.err (!%p2321_p7)
}
  0x1e   : > { %s2325_s24 = scalar_lea.vmem %s2585_s7, 2048  ;;  %p2333_p1 = scmp.lt.s32.totalorder %s2585_s7, %s2585_s7 }
  0x1f   : > { %p2326_p9 = scmp.ne.s32.totalorder %s2585_s7, %s2325_s24  ;;  %p2334_p12 = scmp.lt.s32.totalorder %s2325_s24, %s2325_s24 }
  0x21   : > { %p2328_p10 = pnand %p2326_p9, %p2314_p13  ;;  %p2335_p0 = por %p2334_p12, %p2333_p1 }
  0x23   : > { %p2329_p6 = pneg %p2328_p10 }
  0x25   : > { %p2336_p4 = pnand %p2335_p0, %p2329_p6 }
  0x27   : > { %2339 = shalt.err (!%p2336_p4)
}
  0x28   : > { %s2488_s25 = smov 128   ;;  %s2489_s6 = smov 8  }
  0x29   : > { %2052 = dma.hbm_to_vmem [thread:$0]  (!%p2592_p11), %s3165_s1, 2048, %s2585_s7, [#allocation7], %s2488_s25, %s2488_s25, %s2489_s6  }
  0x2a   : > { %s2340_s14 = scalar_lea.hbm %s3167_s3, 4096 }
  0x2b   : > { %p2341_p1 = scmp.ne.s32.totalorder %s3167_s3, %s2340_s14  ;;  %p2347_p10 = scmp.lt.u32.totalorder %s2340_s14, %s3167_s3 }
  0x2d   : > { %p2343_p4 = pnand %p2341_p1, %p2314_p13 }
  0x2f   : > { %p2344_p6 = pneg %p2343_p4 }
  0x31   : > { %p2349_p3 = pnand %p2347_p10, %p2344_p6 }
  0x33   : > { %2352 = shalt.err (!%p2349_p3)
}
  0x34   : > { %s2353_s7 = scalar_lea.vmem %s2596_s10, 4096  ;;  %p2361_p12 = scmp.lt.s32.totalorder %s2596_s10, %s2596_s10 }
  0x35   : > { %p2354_p5 = scmp.ne.s32.totalorder %s2596_s10, %s2353_s7  ;;  %p2362_p0 = scmp.lt.s32.totalorder %s2353_s7, %s2353_s7 }
  0x37   : > { %p2356_p7 = pnand %p2354_p5, %p2314_p13  ;;  %p2363_p1 = por %p2362_p0, %p2361_p12 }
  0x39   : > { %p2357_p9 = pneg %p2356_p7 }
  0x3b   : > { %p2364_p4 = pnand %p2363_p1, %p2357_p9 }
  0x3d   : > { %2367 = shalt.err (!%p2364_p4)
}
  0x3e   : > { %2055 = dma.hbm_to_vmem [thread:$0]  (!%p2592_p11), %s3167_s3, 4096, %s2596_s10, [#allocation7], %s2488_s25, %s2488_s25, %s2489_s6  }
  0x3f   : > { %s34_s12 = sadd.s32 1, %s2480_s22  ;;  %s41_s13 = sadd.s32 1, %s2472_s20 }
  0x40   : > { %p36_p13 = scmp.ge.s32.totalorder %s34_s12, 2  ;;  %p48_p6 = scmp.ne.s32.totalorder %s2472_s20, %s2468_s19 }
  0x41   : > { %p49_p10 = scmp.eq.s32.totalorder %s2484_s23, 0  ;;  %p2066_p3 = scmp.lt.s32.totalorder %s2484_s23, 2 }
  0x42   : > { %s3193_s12 = smov (%p36_p13, %s34_s12), 0  ;;  %p2660_p7 = por %p2565_p2, %p48_p6 }
  0x43   : > { %p50_p5 = por %p49_p10, %p48_p6  ;;  %s38_s14 = ssub.s32 %s2480_s22, %s3193_s12 }
  0x44   : > { %s3180_s8 = scalar_select %p2660_p7, 1, 0 }
  0x45   : > { %s240_s15 = sand.u32 1, %s2472_s20   ;;  %p39_p9 = scmp.eq.s32.totalorder %s38_s14, 0 }
  0x46   : > { %s2034_s10 = smul.u32 100, %s240_s15  ;;  %p2667_p11 = pnand %p2066_p3, %p50_p5 }
  0x47   : > { %s2672_s6 = scalar_select %p39_p9, %s2472_s20, %s41_s13  }
  0x48   : > { %s1947_s16 = smul.u32 1600, %s2480_s22  ;;  %s244_s17 = scalar_lea.vmem [#allocation3], %s2034_s10 }
  0x49   : > { %s251_s24 = sshll.u32 %s244_s17, 4  ;;  %s2682_s11 = scalar_lea.sflag [#allocation4], %s240_s15  ;;  %s2680_s24 = int_to_ptr.vmem [resolvable:$true] %s251_s24 }
  0x4a   : > { %s2678_s9 = scalar_lea.hbm %s3164_s0, %s1947_s16  ;;  %p2370_p12 = pneg %p2667_p11 }
  0x4b   : > { %s2368_s14 = scalar_lea.hbm %s2678_s9, 1600  ;;  %s2373_s16 = scalar_lea.hbm %s3164_s0, 3200 }
  0x4c   : > { %p2369_p2 = scmp.ne.s32.totalorder %s2678_s9, %s2368_s14  ;;  %p2374_p4 = scmp.lt.u32.totalorder %s2678_s9, %s3164_s0 }
  0x4d   : > { %p2375_p13 = scmp.lt.u32.totalorder %s2373_s16, %s2368_s14  ;;  %p2377_p10 = scmp.lt.u32.totalorder %s2368_s14, %s2678_s9 }
  0x4e   : > { %p2371_p0 = pnand %p2370_p12, %p2369_p2 }
  0x4f   : > { %p2376_p6 = por %p2375_p13, %p2374_p4 }
  0x50   : > { %p2372_p1 = pneg %p2371_p0 }
  0x51   : > { %p2378_p3 = por %p2377_p10, %p2376_p6 }
  0x53   : > { %p2379_p5 = pnand %p2378_p3, %p2372_p1 }
  0x55   : > { %2382 = shalt.err (!%p2379_p5)
}
  0x56   : > { %s2383_s15 = scalar_lea.vmem %s2680_s24, 1600  ;;  %s2490_s7 = smov [#allocation3]  }
  0x57   : > { %p2384_p9 = scmp.ne.s32.totalorder %s2680_s24, %s2383_s15  ;;  %s2388_s13 = sshll.u32 %s2490_s7, 4  ;;  %s2389_s13 = int_to_ptr.vmem [resolvable:$false] %s2388_s13 }
  0x58   : > { %s2390_s10 = scalar_lea.vmem %s2389_s13, 3200  ;;  %p2391_p7 = scmp.lt.s32.totalorder %s2680_s24, %s2389_s13 }
  0x59   : > { %p2386_p2 = pnand %p2384_p9, %p2370_p12  ;;  %p2392_p4 = scmp.lt.s32.totalorder %s2390_s10, %s2383_s15 }
  0x5b   : > { %p2387_p0 = pneg %p2386_p2  ;;  %p2393_p13 = por %p2392_p4, %p2391_p7 }
  0x5d   : > { %p2394_p6 = pnand %p2393_p13, %p2387_p0 }
  0x5f   : > { %2397 = shalt.err (!%p2394_p6)
}
  0x60   : > { %s2491_s14 = smov 64   ;;  %s2492_s16 = smov 4  }
  0x61   : > { %2059 = dma.hbm_to_vmem [thread:$0]  (!%p2667_p11), %s2678_s9, 1600, %s2680_s24, %s2682_s11, %s2491_s14, %s2491_s14, %s2492_s16  }
  0x62   : > { %263 = sbr.rel (%p2581_p8) target bundleno = 707 (0x2c3), region = 40  ;;  %s2713_s17 = sand.u32 (!%p2581_p8), 1, %s2468_s19  }
  0x63   : > { %s2035_s27 = smul.u32 (!%p2581_p8), 100, %s2713_s17  ;;  %s266_s15 = scalar_lea.sflag (!%p2581_p8), [#allocation4], %s2713_s17 }
  0x64   : > { %p3182_p7 = scmp.ne.s32.totalorder (!%p2581_p8), %s3176_s28, 0 }
  0x65   : > { %s2717_s7 = scalar_lea.vmem (!%p2581_p8), [#allocation3], %s2035_s27 }
  0x69   : > { %2451 = dma.done.wait (%p3182_p7), %s266_s15, 1600  }
  0x6a   : > { %2453 = vsyncadd (%p3182_p7), %s266_s15, 4294965696  ;;  %p3183_p11 = scmp.ne.s32.totalorder %s3174_s26, 0 }
  0x6c   : > { %2455 = dma.done.wait (%p3183_p11), [#allocation7], 6144  }
  0x6d   : > { %2457 = vsyncadd (%p3183_p11), [#allocation7], 4294961152  ;;  %v2493_v0 = vmov 0   ;;  %v2127_v1 = vld [vmem:[#allocation6 + $0x4] ss:$8 sps:$4 sm:$0xff]   ;;  %v2151_v20 = vld [vmem:[%s2717_s7] sm:$0xff]   ;;  %v365_v62 = vlaneseq }
  0x6e   : > { %563 = vmatprep.mubr.bf16.mxu0 %v2493_v0  ;;  %v2129_v2 = vld [vmem:[#allocation6] ss:$8 sps:$4 sm:$0xff]   ;;  %531 = vmatprep.subr.bf16.mxu0 %v2127_v1  ;;  %v2130_v3 = vld [vmem:[#allocation6 + $0x14] ss:$8 sps:$4 sm:$0xff]   ;;  %v2132_v4 = vld [vmem:[#allocation6 + $0x10] ss:$8 sps:$4 sm:$0xff]  }
  0x6f   : > { %532 = vmatpush1.bf16.msra.mxu0 %v2129_v2  ;;  %v2133_v5 = vld [vmem:[#allocation6 + $0x24] ss:$8 sps:$4 sm:$0xff]   ;;  %v2135_v6 = vld [vmem:[#allocation6 + $0x20] ss:$8 sps:$4 sm:$0xff]   ;;  %v2136_v7 = vld [vmem:[#allocation6 + $0x34] ss:$8 sps:$4 sm:$0xff]  }
  0x70   : > { %533 = vmatprep.subr.bf16.mxu0 %v2130_v3  ;;  %v2138_v8 = vld [vmem:[#allocation6 + $0x30] ss:$8 sps:$4 sm:$0xff]   ;;  %v2139_v9 = vld [vmem:[#allocation6 + $0x44] ss:$8 sps:$4 sm:$0xff]   ;;  %v2141_v10 = vld [vmem:[#allocation6 + $0x40] ss:$8 sps:$4 sm:$0xff]  }
  0x71   : > { %v2142_v11 = vld [vmem:[#allocation6 + $0x54] ss:$8 sps:$4 sm:$0xff]   ;;  %v2144_v12 = vld [vmem:[#allocation6 + $0x50] ss:$8 sps:$4 sm:$0xff]   ;;  %v2145_v13 = vld [vmem:[#allocation6 + $0x64] ss:$8 sps:$4 sm:$0xff]  }
  0x72   : > { %v2147_v14 = vld [vmem:[#allocation6 + $0x60] ss:$8 sps:$4 sm:$0xff]   ;;  %v2148_v15 = vld [vmem:[#allocation6 + $0x74] ss:$8 sps:$4 sm:$0xff]   ;;  %v2166_v16 = vld [vmem:[#allocation8 + $0x4] ss:$8 sps:$4 sm:$0xff]  }
  0x73   : > { %534 = vmatpush1.bf16.msra.mxu0 %v2132_v4  ;;  %v2164_v17 = vld [vmem:[#allocation8] ss:$8 sps:$4 sm:$0xff]   ;;  %v2169_v18 = vld [vmem:[#allocation8 + $0x14] ss:$8 sps:$4 sm:$0xff]   ;;  %2002 = vmatprep.subr.bf16.mxu1 %v2166_v16  ;;  %v2150_v19 = vld [vmem:[#allocation6 + $0x70] ss:$8 sps:$4 sm:$0xff]  }
  0x74   : > { %535 = vmatprep.subr.bf16.mxu0 %v2133_v5  ;;  %2018 = vmatpush1.bf16.msra.mxu1 %v2164_v17  ;;  %v2167_v21 = vld [vmem:[#allocation8 + $0x10] ss:$8 sps:$4 sm:$0xff]   ;;  %v2172_v22 = vld [vmem:[#allocation8 + $0x24] ss:$8 sps:$4 sm:$0xff]   ;;  %v2170_v23 = vld [vmem:[#allocation8 + $0x20] ss:$8 sps:$4 sm:$0xff]  }
  0x75   : > { %2003 = vmatprep.subr.bf16.mxu1 %v2169_v18  ;;  %v2175_v24 = vld [vmem:[#allocation8 + $0x34] ss:$8 sps:$4 sm:$0xff]   ;;  %v2152_v25 = vld [vmem:[%s2717_s7 + $0x8] sm:$0xff]   ;;  %v2173_v26 = vld [vmem:[#allocation8 + $0x30] ss:$8 sps:$4 sm:$0xff]   ;;  %v2753_v63 = vshrl.u32 %v365_v62, 7 }
  0x76   : > { %v2178_v27 = vld [vmem:[#allocation8 + $0x44] ss:$8 sps:$4 sm:$0xff]   ;;  %v2176_v28 = vld [vmem:[#allocation8 + $0x40] ss:$8 sps:$4 sm:$0xff]   ;;  %v2181_v29 = vld [vmem:[#allocation8 + $0x54] ss:$8 sps:$4 sm:$0xff]  }
  0x77   : > { %536 = vmatpush1.bf16.msra.mxu0 %v2135_v6  ;;  %v2153_v30 = vld [vmem:[%s2717_s7 + $0x10] sm:$0xff]   ;;  %v2187_v34 = vld [vmem:[#allocation8 + $0x74] ss:$8 sps:$4 sm:$0xff]   ;;  %v2156_v40 = vld [vmem:[%s2717_s7 + $0x28] sm:$0xff]   ;;  %v371_v2 = vsub.s32 1, %v2753_v63  ;;  %s2036_s24 = smul.u32 400, %s2713_s17 }
  0x78   : > { %537 = vmatprep.subr.bf16.mxu0 %v2136_v7  ;;  %2019 = vmatpush1.bf16.msra.mxu1 %v2167_v21  ;;  %v2179_v31 = vld [vmem:[#allocation8 + $0x50] ss:$8 sps:$4 sm:$0xff]   ;;  %v2184_v32 = vld [vmem:[#allocation8 + $0x64] ss:$8 sps:$4 sm:$0xff]   ;;  %v2182_v33 = vld [vmem:[#allocation8 + $0x60] ss:$8 sps:$4 sm:$0xff]  }
  0x79   : > { %2004 = vmatprep.subr.bf16.mxu1 %v2172_v22  ;;  %v2154_v35 = vld [vmem:[%s2717_s7 + $0x18] sm:$0xff]   ;;  %v2190_v37 = vld [vmem:[#allocation8 + $0x84] ss:$8 sps:$4 sm:$0xff]   ;;  %v2188_v38 = vld [vmem:[#allocation8 + $0x80] ss:$8 sps:$4 sm:$0xff]   ;;  %s3008_s9 = scalar_lea.vmem [#allocation9], %s2036_s24 }
  0x7a   : > { %v2185_v36 = vld [vmem:[#allocation8 + $0x70] ss:$8 sps:$4 sm:$0xff]   ;;  %v2160_v44 = vld [vmem:[%s2717_s7 + $0x48] sm:$0xff]   ;;  %v2193_v46 = vld [vmem:[#allocation8 + $0x94] ss:$8 sps:$4 sm:$0xff]   ;;  %s1975_s11 = smul.u32 6400, %s2476_s21 }
  0x7b   : > { %538 = vmatpush1.bf16.msra.mxu0 %v2138_v8  ;;  %v2155_v39 = vld [vmem:[%s2717_s7 + $0x20] sm:$0xff]   ;;  %v2157_v41 = vld [vmem:[%s2717_s7 + $0x30] sm:$0xff]   ;;  %v2158_v42 = vld [vmem:[%s2717_s7 + $0x38] sm:$0xff]   ;;  %s1703_s13 = sshll.u32 %s3008_s9, 4  ;;  %s1687_s21 = scalar_lea.sflag [#allocation5], %s2713_s17  ;;  %s3112_s13 = int_to_ptr.vmem [resolvable:$true] %s1703_s13 }
  0x7c   : > { %539 = vmatprep.subr.bf16.mxu0 %v2139_v9  ;;  %2020 = vmatpush1.bf16.msra.mxu1 %v2170_v23  ;;  %v2159_v43 = vld [vmem:[%s2717_s7 + $0x40] sm:$0xff]   ;;  %v2161_v45 = vld [vmem:[%s2717_s7 + $0x50] sm:$0xff]   ;;  %v2162_v48 = vld [vmem:[%s2717_s7 + $0x58] sm:$0xff]   ;;  %s3110_s16 = scalar_lea.hbm %s3169_s5, %s1975_s11  ;;  %s2398_s27 = scalar_lea.vmem %s3112_s13, 6400 }
  0x7d   : > { %2005 = vmatprep.subr.bf16.mxu1 %v2175_v24  ;;  %v2191_v47 = vld [vmem:[#allocation8 + $0x90] ss:$8 sps:$4 sm:$0xff]   ;;  %v2196_v49 = vld [vmem:[#allocation8 + $0xa4] ss:$8 sps:$4 sm:$0xff]   ;;  %v2194_v50 = vld [vmem:[#allocation8 + $0xa0] ss:$8 sps:$4 sm:$0xff]   ;;  %p2399_p8 = scmp.ne.s32.totalorder %s3112_s13, %s2398_s27 }
  0x7e   : > { %v2199_v51 = vld [vmem:[#allocation8 + $0xb4] ss:$8 sps:$4 sm:$0xff]   ;;  %v2197_v52 = vld [vmem:[#allocation8 + $0xb0] ss:$8 sps:$4 sm:$0xff]   ;;  %v2202_v54 = vld [vmem:[#allocation8 + $0xc4] ss:$8 sps:$4 sm:$0xff]  }
  0x7f   : > { %540 = vmatpush1.bf16.msra.mxu0 %v2141_v10  ;;  %v2163_v53 = vld [vmem:[%s2717_s7 + $0x60] ss:$0 sps:$4 sm:$0xff]   ;;  %v2200_v55 = vld [vmem:[#allocation8 + $0xc0] ss:$8 sps:$4 sm:$0xff]   ;;  %v2208_v58 = vld [vmem:[#allocation8 + $0xe4] ss:$8 sps:$4 sm:$0xff]  }
  0x80   : > { %541 = vmatprep.subr.bf16.mxu0 %v2142_v11  ;;  %2021 = vmatpush1.bf16.msra.mxu1 %v2173_v26  ;;  %v2205_v56 = vld [vmem:[#allocation8 + $0xd4] ss:$8 sps:$4 sm:$0xff]   ;;  %v2203_v57 = vld [vmem:[#allocation8 + $0xd0] ss:$8 sps:$4 sm:$0xff]   ;;  %v2206_v59 = vld [vmem:[#allocation8 + $0xe0] ss:$8 sps:$4 sm:$0xff]  }
  0x81   : > { %2006 = vmatprep.subr.bf16.mxu1 %v2178_v27  ;;  %v2211_v60 = vld [vmem:[#allocation8 + $0xf4] ss:$8 sps:$4 sm:$0xff]   ;;  %v2209_v61 = vld [vmem:[#allocation8 + $0xf0] ss:$8 sps:$4 sm:$0xff]   ;;  %p3184_p12 = scmp.ne.s32.totalorder %s3180_s8, 0  ;;  %s2494_s15 = smov [#allocation9]  }
  0x82   : > { %v363_v1 = vld [vmem:[%s3166_s2] sm:$0x3]  ;;  %s2402_s7 = sshll.u32 %s2494_s15, 4  ;;  %s2403_s7 = int_to_ptr.vmem [resolvable:$false] %s2402_s7 }
  0x83   : > { %542 = vmatpush1.bf16.msra.mxu0 %v2144_v12  ;;  %v2766_v4 = vrot.slane %v363_v1, %v371_v2  ;;  %p2400_p1 = pnand %p2399_p8, %p3184_p12  ;;  %s2404_s26 = scalar_lea.vmem %s2403_s7, 12800 }
  0x84   : > { %543 = vmatprep.subr.bf16.mxu0 %v2145_v13  ;;  %2022 = vmatpush1.bf16.msra.mxu1 %v2176_v28  ;;  %p2405_p3 = scmp.lt.s32.totalorder %s3112_s13, %s2403_s7  ;;  %p2406_p5 = scmp.lt.s32.totalorder %s2404_s26, %s2398_s27 }
  0x85   : > { %2007 = vmatprep.subr.bf16.mxu1 %v2181_v29  ;;  %p2401_p10 = pneg %p2400_p1 }
  0x86   : > { %p2407_p9 = por %p2406_p5, %p2405_p3 }
  0x87   : > { %544 = vmatpush1.bf16.msra.mxu0 %v2147_v14 }
  0x88   : > { %545 = vmatprep.subr.bf16.mxu0 %v2148_v15  ;;  %2023 = vmatpush1.bf16.msra.mxu1 %v2179_v31  ;;  %p2408_p2 = pnand %p2407_p9, %p2401_p10 }
  0x89   : > { %2008 = vmatprep.subr.bf16.mxu1 %v2184_v32 }
  0x8b   : > { %546 = vmatpush1.bf16.msra.mxu0 %v2150_v19 }
  0x8c   : > { %1475 = vmatprep.subr.bf16.mxu0 %v2166_v16  ;;  %2024 = vmatpush1.bf16.msra.mxu1 %v2182_v33 }
  0x8d   : > { %2009 = vmatprep.subr.bf16.mxu1 %v2187_v34 }
  0x8e   : > { %564 = vmatmul.mubr.bf16.vlgmr.msra.gmra.mrb[0].mxu0 %v2151_v20 }
  0x8f   : > { %573 = vmatprep.mubr.bf16.mxu0 %v2493_v0  ;;  %1476 = vmatpush1.bf16.msra.mxu0 %v2164_v17 }
  0x90   : > { %1477 = vmatprep.subr.bf16.mxu0 %v2169_v18  ;;  %2025 = vmatpush1.bf16.msra.mxu1 %v2185_v36 }
  0x91   : > { %2010 = vmatprep.subr.bf16.mxu1 %v2190_v37 }
  0x93   : > { %1478 = vmatpush1.bf16.msra.mxu0 %v2167_v21 }
  0x94   : > { %1479 = vmatprep.subr.bf16.mxu0 %v2172_v22  ;;  %2026 = vmatpush1.bf16.msra.mxu1 %v2188_v38 }
  0x95   : > { %2011 = vmatprep.subr.bf16.mxu1 %v2193_v46 }
  0x96   : > { %574 = vmatmul.mubr.bf16.gmra.mrb[4].mxu0 %v2152_v25 }
  0x97   : > { %583 = vmatprep.mubr.bf16.mxu0 %v2493_v0  ;;  %1480 = vmatpush1.bf16.msra.mxu0 %v2170_v23 }
  0x98   : > { %1481 = vmatprep.subr.bf16.mxu0 %v2175_v24  ;;  %2027 = vmatpush1.bf16.msra.mxu1 %v2191_v47 }
  0x99   : > { %2012 = vmatprep.subr.bf16.mxu1 %v2196_v49 }
  0x9b   : > { %1482 = vmatpush1.bf16.msra.mxu0 %v2173_v26 }
  0x9c   : > { %1483 = vmatprep.subr.bf16.mxu0 %v2178_v27  ;;  %2028 = vmatpush1.bf16.msra.mxu1 %v2194_v50 }
  0x9d   : > { %2013 = vmatprep.subr.bf16.mxu1 %v2199_v51 }
  0x9e   : > { %584 = vmatmul.mubr.bf16.gmra.mrb[8].mxu0 %v2153_v30 }
  0x9f   : > { %593 = vmatprep.mubr.bf16.mxu0 %v2493_v0  ;;  %1484 = vmatpush1.bf16.msra.mxu0 %v2176_v28 }
  0xa0   : > { %1485 = vmatprep.subr.bf16.mxu0 %v2181_v29  ;;  %2029 = vmatpush1.bf16.msra.mxu1 %v2197_v52 }
  0xa1   : > { %2014 = vmatprep.subr.bf16.mxu1 %v2202_v54 }
  0xa3   : > { %1486 = vmatpush1.bf16.msra.mxu0 %v2179_v31 }
  0xa4   : > { %1487 = vmatprep.subr.bf16.mxu0 %v2184_v32  ;;  %2030 = vmatpush1.bf16.msra.mxu1 %v2200_v55 }
  0xa5   : > { %2015 = vmatprep.subr.bf16.mxu1 %v2205_v56 }
  0xa6   : > { %594 = vmatmul.mubr.bf16.gmra.mrb[12].mxu0 %v2154_v35 }
  0xa7   : > { %603 = vmatprep.mubr.bf16.mxu0 %v2493_v0  ;;  %1488 = vmatpush1.bf16.msra.mxu0 %v2182_v33 }
  0xa8   : > { %1489 = vmatprep.subr.bf16.mxu0 %v2187_v34  ;;  %2031 = vmatpush1.bf16.msra.mxu1 %v2203_v57 }
  0xa9   : > { %2016 = vmatprep.subr.bf16.mxu1 %v2208_v58 }
  0xab   : > { %1490 = vmatpush1.bf16.msra.mxu0 %v2185_v36 }
  0xac   : > { %1491 = vmatprep.subr.bf16.mxu0 %v2190_v37  ;;  %2032 = vmatpush1.bf16.msra.mxu1 %v2206_v59 }
  0xad   : > { %2017 = vmatprep.subr.bf16.mxu1 %v2211_v60 }
  0xae   : > { %604 = vmatmul.mubr.bf16.gmra.mrb[16].mxu0 %v2155_v39 }
  0xaf   : > { %613 = vmatprep.mubr.bf16.mxu0 %v2493_v0  ;;  %1492 = vmatpush1.bf16.msra.mxu0 %v2188_v38 }
  0xb0   : > { %1493 = vmatprep.subr.bf16.mxu0 %v2193_v46  ;;  %2033 = vmatpush1.bf16.msra.mxu1 %v2209_v61 }
  0xb3   : > { %1494 = vmatpush1.bf16.msra.mxu0 %v2191_v47 }
  0xb4   : > { %1495 = vmatprep.subr.bf16.mxu0 %v2196_v49 }
  0xb6   : > { %614 = vmatmul.mubr.bf16.gmra.mrb[20].mxu0 %v2156_v40 }
  0xb7   : > { %623 = vmatprep.mubr.bf16.mxu0 %v2493_v0  ;;  %1496 = vmatpush1.bf16.msra.mxu0 %v2194_v50 }
  0xb8   : > { %1497 = vmatprep.subr.bf16.mxu0 %v2199_v51 }
  0xbb   : > { %1498 = vmatpush1.bf16.msra.mxu0 %v2197_v52 }
  0xbc   : > { %1499 = vmatprep.subr.bf16.mxu0 %v2202_v54 }
  0xbe   : > { %624 = vmatmul.mubr.bf16.gmra.mrb[24].mxu0 %v2157_v41 }
  0xbf   : > { %633 = vmatprep.mubr.bf16.mxu0 %v2493_v0  ;;  %1500 = vmatpush1.bf16.msra.mxu0 %v2200_v55 }
  0xc0   : > { %1501 = vmatprep.subr.bf16.mxu0 %v2205_v56 }
  0xc3   : > { %1502 = vmatpush1.bf16.msra.mxu0 %v2203_v57 }
  0xc4   : > { %1503 = vmatprep.subr.bf16.mxu0 %v2208_v58 }
  0xc6   : > { %634 = vmatmul.mubr.bf16.gmra.mrb[28].mxu0 %v2158_v42 }
  0xc7   : > { %643 = vmatprep.mubr.bf16.mxu0 %v2493_v0  ;;  %1504 = vmatpush1.bf16.msra.mxu0 %v2206_v59 }
  0xc8   : > { %1505 = vmatprep.subr.bf16.mxu0 %v2211_v60 }
  0xcb   : > { %1506 = vmatpush1.bf16.msra.mxu0 %v2209_v61 }
  0xce   : > { %644 = vmatmul.mubr.bf16.gmra.mrb[32].mxu0 %v2159_v43 }
  0xcf   : > { %653 = vmatprep.mubr.bf16.mxu0 %v2493_v0 }
  0xd6   : > { %654 = vmatmul.mubr.bf16.gmra.mrb[36].mxu0 %v2160_v44 }
  0xd7   : > { %663 = vmatprep.mubr.bf16.mxu0 %v2493_v0 }
  0xde   : > { %664 = vmatmul.mubr.bf16.gmra.mrb[40].mxu0 %v2161_v45 }
  0xdf   : > { %673 = vmatprep.mubr.bf16.mxu0 %v2493_v0 }
  0xe6   : > { %674 = vmatmul.mubr.bf16.gmra.mrb[44].mxu0 %v2162_v48 }
  0xe7   : > { %683 = vmatprep.mubr.bf16.mxu0 %v2493_v0  ;;  %v367_v0 = vsub.s32 0, %v2753_v63 }
  0xe9   : > { %v2762_v3 = vrot.slane %v363_v1, %v367_v0 }
  0xee   : > { %684 = vmatmul.mubr.bf16.gmra.mrb[48].mxu0 %v2163_v53 }
 0x161   : > { %v565_v5 = vpop.f32.mrb[0].mxu0 }
 0x162   : > { %v566_v6 = vadd.f32 %v565_v5, %v2762_v3  ;;  %v567_v7 = vpop.f32.mrb[1].mxu0 }
 0x163   : > { %v568_v8 = vadd.f32 %v567_v7, %v2766_v4  ;;  %v569_v9 = vpop.f32.mrb[2].mxu0 }
 0x164   : > { %v692_v10 = vmul.f32 0.70710677, %v566_v6  ;;  %v570_v11 = vadd.f32 %v569_v9, %v2762_v3  ;;  %v571_v12 = vpop.f32.mrb[3].mxu0 }
 0x165   : > { %v693_v13 = vmul.f32 0.70710677, %v568_v8  ;;  %v572_v14 = vadd.f32 %v571_v12, %v2766_v4 }
 0x166   : > { %2212 = verf.f32 %v692_v10  ;;  %v694_v15 = vmul.f32 0.70710677, %v570_v11 }
 0x167   : > { %2214 = verf.f32 %v693_v13  ;;  %v695_v16 = vmul.f32 0.70710677, %v572_v14 }
 0x168   : > { %2216 = verf.f32 %v694_v15 }
 0x169   : > { %2218 = verf.f32 %v695_v16  ;;  %v575_v17 = vpop.f32.mrb[4].mxu0 }
 0x16a   : > { %v2773_v18 = vadd.f32 %v575_v17, %v2762_v3  ;;  %v577_v19 = vpop.f32.mrb[5].mxu0 }
 0x16b   : > { %v2776_v20 = vadd.f32 %v577_v19, %v2766_v4  ;;  %v579_v21 = vpop.f32.mrb[6].mxu0 }
 0x16c   : > { %v696_v22 = vmul.f32 0.70710677, %v2773_v18  ;;  %v2780_v23 = vadd.f32 %v579_v21, %v2762_v3  ;;  %v581_v24 = vpop.f32.mrb[7].mxu0 }
 0x16d   : > { %v697_v25 = vmul.f32 0.70710677, %v2776_v20  ;;  %v2784_v26 = vadd.f32 %v581_v24, %v2766_v4 }
 0x16e   : > { %2220 = verf.f32 %v696_v22  ;;  %v698_v27 = vmul.f32 0.70710677, %v2780_v23 }
 0x16f   : > { %2222 = verf.f32 %v697_v25  ;;  %v699_v28 = vmul.f32 0.70710677, %v2784_v26 }
 0x170   : > { %v2213_v29 = vpop.eup %2212  ;;  %2224 = verf.f32 %v698_v27 }
 0x171   : > { %v2215_v30 = vpop.eup %2214  ;;  %v792_v31 = vadd.f32 1.0, %v2213_v29  ;;  %2226 = verf.f32 %v699_v28  ;;  %v585_v32 = vpop.f32.mrb[8].mxu0 }
 0x172   : > { %v2217_v33 = vpop.eup %2216  ;;  %v793_v34 = vadd.f32 1.0, %v2215_v30  ;;  %v2789_v35 = vadd.f32 %v585_v32, %v2762_v3  ;;  %v587_v36 = vpop.f32.mrb[9].mxu0 }
 0x173   : > { %v2219_v37 = vpop.eup %2218  ;;  %v842_v38 = vmul.f32 0.5, %v792_v31  ;;  %v794_v39 = vadd.f32 1.0, %v2217_v33  ;;  %v2792_v40 = vadd.f32 %v587_v36, %v2766_v4  ;;  %v589_v41 = vpop.f32.mrb[10].mxu0 }
 0x174   : > { %v843_v42 = vmul.f32 0.5, %v793_v34  ;;  %v795_v43 = vadd.f32 1.0, %v2219_v37  ;;  %v700_v44 = vmul.f32 0.70710677, %v2789_v35  ;;  %v2796_v45 = vadd.f32 %v589_v41, %v2762_v3  ;;  %v591_v46 = vpop.f32.mrb[11].mxu0 }
 0x175   : > { %v844_v47 = vmul.f32 0.5, %v794_v39  ;;  %v701_v48 = vmul.f32 0.70710677, %v2792_v40  ;;  %v2800_v49 = vadd.f32 %v591_v46, %v2766_v4  ;;  %v892_v52 = vmul.f32 %v842_v38, %v566_v6 }
 0x176   : > { %v845_v50 = vmul.f32 0.5, %v795_v43  ;;  %2228 = verf.f32 %v700_v44  ;;  %v702_v51 = vmul.f32 0.70710677, %v2796_v45  ;;  %v893_v56 = vmul.f32 %v843_v42, %v568_v8 }
 0x177   : > { %v894_v53 = vmul.f32 %v844_v47, %v570_v11  ;;  %2230 = verf.f32 %v701_v48  ;;  %v703_v54 = vmul.f32 0.70710677, %v2800_v49 }
 0x178   : > { %v2221_v55 = vpop.eup %2220  ;;  %v895_v57 = vmul.f32 %v845_v50, %v572_v14  ;;  %2232 = verf.f32 %v702_v51 }
 0x179   : > { %v2223_v58 = vpop.eup %2222  ;;  %v1976_v59 = vpack.c.bf16 %v894_v53, %v892_v52  ;;  %v796_v60 = vadd.f32 1.0, %v2221_v55  ;;  %2234 = verf.f32 %v703_v54  ;;  %v595_v61 = vpop.f32.mrb[12].mxu0 }
 0x17a   : > { %v2225_v62 = vpop.eup %2224  ;;  %v797_v1 = vadd.f32 1.0, %v2223_v58  ;;  %v2805_v5 = vadd.f32 %v595_v61, %v2762_v3  ;;  %v597_v7 = vpop.f32.mrb[13].mxu0  ;;  %v1977_v6 = vpack.c.bf16 %v895_v57, %v893_v56 }
 0x17b   : > { %v2227_v9 = vpop.eup %2226  ;;  %v846_v10 = vmul.f32 0.5, %v796_v60  ;;  %v798_v11 = vadd.f32 1.0, %v2225_v62  ;;  %v2808_v12 = vadd.f32 %v597_v7, %v2766_v4  ;;  %v599_v8 = vpop.f32.mrb[14].mxu0 }
 0x17c   : > { %v847_v13 = vmul.f32 0.5, %v797_v1  ;;  %v799_v14 = vadd.f32 1.0, %v2227_v9  ;;  %v704_v15 = vmul.f32 0.70710677, %v2805_v5  ;;  %v2812_v16 = vadd.f32 %v599_v8, %v2762_v3  ;;  %v601_v17 = vpop.f32.mrb[15].mxu0  ;;  %1507 = vmatprep.mubr.bf16.mxu0 %v1977_v6 }
 0x17d   : > { %v848_v19 = vmul.f32 0.5, %v798_v11  ;;  %v705_v21 = vmul.f32 0.70710677, %v2808_v12  ;;  %v2816_v22 = vadd.f32 %v601_v17, %v2766_v4  ;;  %1508 = vmatmul.mubr.bf16.vlgmr.msra.gmra.mrb[52].mxu0 %v1976_v59  ;;  %v896_v27 = vmul.f32 %v846_v10, %v2773_v18 }
 0x17e   : > { %v849_v24 = vmul.f32 0.5, %v799_v14  ;;  %2236 = verf.f32 %v704_v15  ;;  %v706_v25 = vmul.f32 0.70710677, %v2812_v16  ;;  %v897_v31 = vmul.f32 %v847_v13, %v2776_v20 }
 0x17f   : > { %v898_v28 = vmul.f32 %v848_v19, %v2780_v23  ;;  %2238 = verf.f32 %v705_v21  ;;  %v707_v29 = vmul.f32 0.70710677, %v2816_v22 }
 0x180   : > { %v2229_v30 = vpop.eup %2228  ;;  %v899_v32 = vmul.f32 %v849_v24, %v2784_v26  ;;  %2240 = verf.f32 %v706_v25 }
 0x181   : > { %v2231_v33 = vpop.eup %2230  ;;  %v800_v34 = vadd.f32 1.0, %v2229_v30  ;;  %2242 = verf.f32 %v707_v29  ;;  %v605_v36 = vpop.f32.mrb[16].mxu0  ;;  %v1978_v37 = vpack.c.bf16 %v898_v28, %v896_v27 }
 0x182   : > { %v2233_v38 = vpop.eup %2232  ;;  %v2825_v39 = vadd.f32 %v605_v36, %v2762_v3  ;;  %v607_v18 = vpop.f32.mrb[17].mxu0  ;;  %v1979_v23 = vpack.c.bf16 %v899_v32, %v897_v31  ;;  %v801_v41 = vadd.f32 1.0, %v2231_v33 }
 0x183   : > { %v2235_v42 = vpop.eup %2234  ;;  %v850_v43 = vmul.f32 0.5, %v800_v34  ;;  %v802_v44 = vadd.f32 1.0, %v2233_v38  ;;  %v2828_v20 = vadd.f32 %v607_v18, %v2766_v4  ;;  %v609_v26 = vpop.f32.mrb[18].mxu0 }
 0x184   : > { %v708_v46 = vmul.f32 0.70710677, %v2825_v39  ;;  %v2832_v47 = vadd.f32 %v609_v26, %v2762_v3  ;;  %v611_v48 = vpop.f32.mrb[19].mxu0  ;;  %1517 = vmatprep.mubr.bf16.mxu0 %v1979_v23  ;;  %v803_v50 = vadd.f32 1.0, %v2235_v42  ;;  %v851_v51 = vmul.f32 0.5, %v801_v41 }
 0x185   : > { %v852_v52 = vmul.f32 0.5, %v802_v44  ;;  %v709_v53 = vmul.f32 0.70710677, %v2828_v20  ;;  %v2836_v54 = vadd.f32 %v611_v48, %v2766_v4  ;;  %1518 = vmatmul.mubr.bf16.gmra.mrb[56].mxu0 %v1978_v37  ;;  %v900_v57 = vmul.f32 %v850_v43, %v2789_v35 }
 0x186   : > { %2244 = verf.f32 %v708_v46  ;;  %v710_v55 = vmul.f32 0.70710677, %v2832_v47  ;;  %v853_v56 = vmul.f32 0.5, %v803_v50  ;;  %v901_v61 = vmul.f32 %v851_v51, %v2792_v40 }
 0x187   : > { %v902_v58 = vmul.f32 %v852_v52, %v2796_v45  ;;  %2246 = verf.f32 %v709_v53  ;;  %v711_v59 = vmul.f32 0.70710677, %v2836_v54 }
 0x188   : > { %v2237_v60 = vpop.eup %2236  ;;  %2248 = verf.f32 %v710_v55  ;;  %v903_v62 = vmul.f32 %v853_v56, %v2800_v49 }
 0x189   : > { %v2239_v1 = vpop.eup %2238  ;;  %v804_v7 = vadd.f32 1.0, %v2237_v60  ;;  %2250 = verf.f32 %v711_v59  ;;  %v615_v6 = vpop.f32.mrb[20].mxu0  ;;  %v1980_v9 = vpack.c.bf16 %v902_v58, %v900_v57 }
 0x18a   : > { %v2241_v10 = vpop.eup %2240  ;;  %v805_v11 = vadd.f32 1.0, %v2239_v1  ;;  %v2845_v35 = vadd.f32 %v615_v6, %v2762_v3  ;;  %v617_v45 = vpop.f32.mrb[21].mxu0  ;;  %v1981_v8 = vpack.c.bf16 %v903_v62, %v901_v61 }
 0x18b   : > { %v2243_v13 = vpop.eup %2242  ;;  %v854_v14 = vmul.f32 0.5, %v804_v7  ;;  %v806_v15 = vadd.f32 1.0, %v2241_v10  ;;  %v2848_v17 = vadd.f32 %v617_v45, %v2766_v4  ;;  %v619_v40 = vpop.f32.mrb[22].mxu0 }
 0x18c   : > { %v855_v49 = vmul.f32 0.5, %v805_v11  ;;  %v807_v19 = vadd.f32 1.0, %v2243_v13  ;;  %v712_v21 = vmul.f32 0.70710677, %v2845_v35  ;;  %v2852_v24 = vadd.f32 %v619_v40, %v2762_v3  ;;  %v621_v25 = vpop.f32.mrb[23].mxu0  ;;  %1527 = vmatprep.mubr.bf16.mxu1 %v1981_v8 }
 0x18d   : > { %v856_v27 = vmul.f32 0.5, %v806_v15  ;;  %v713_v28 = vmul.f32 0.70710677, %v2848_v17  ;;  %v2856_v29 = vadd.f32 %v621_v25, %v2766_v4  ;;  %1528 = vmatmul.mubr.bf16.vlgmr.msra.gmra.mrb[0].mxu1 %v1980_v9  ;;  %v904_v32 = vmul.f32 %v854_v14, %v2805_v5 }
 0x18e   : > { %v857_v30 = vmul.f32 0.5, %v807_v19  ;;  %2252 = verf.f32 %v712_v21  ;;  %v714_v31 = vmul.f32 0.70710677, %v2852_v24  ;;  %v905_v37 = vmul.f32 %v855_v49, %v2808_v12 }
 0x18f   : > { %v906_v33 = vmul.f32 %v856_v27, %v2812_v16  ;;  %2254 = verf.f32 %v713_v28  ;;  %v715_v34 = vmul.f32 0.70710677, %v2856_v29 }
 0x190   : > { %v2245_v36 = vpop.eup %2244  ;;  %v907_v38 = vmul.f32 %v857_v30, %v2816_v22  ;;  %2256 = verf.f32 %v714_v31 }
 0x191   : > { %v2247_v18 = vpop.eup %2246  ;;  %v808_v23 = vadd.f32 1.0, %v2245_v36  ;;  %2258 = verf.f32 %v715_v34  ;;  %v625_v41 = vpop.f32.mrb[24].mxu0  ;;  %v1982_v42 = vpack.c.bf16 %v906_v33, %v904_v32 }
 0x192   : > { %v2249_v43 = vpop.eup %2248  ;;  %v809_v44 = vadd.f32 1.0, %v2247_v18  ;;  %v2865_v5 = vadd.f32 %v625_v41, %v2762_v3  ;;  %v627_v16 = vpop.f32.mrb[25].mxu0  ;;  %v1983_v26 = vpack.c.bf16 %v907_v38, %v905_v37 }
 0x193   : > { %v2251_v46 = vpop.eup %2250  ;;  %v858_v48 = vmul.f32 0.5, %v808_v23  ;;  %v810_v50 = vadd.f32 1.0, %v2249_v43  ;;  %v2868_v12 = vadd.f32 %v627_v16, %v2766_v4  ;;  %v629_v22 = vpop.f32.mrb[26].mxu0 }
 0x194   : > { %v859_v51 = vmul.f32 0.5, %v809_v44  ;;  %v811_v52 = vadd.f32 1.0, %v2251_v46  ;;  %v716_v53 = vmul.f32 0.70710677, %v2865_v5  ;;  %v2872_v55 = vadd.f32 %v629_v22, %v2762_v3  ;;  %v631_v56 = vpop.f32.mrb[27].mxu0  ;;  %1537 = vmatprep.mubr.bf16.mxu1 %v1983_v26 }
 0x195   : > { %v860_v57 = vmul.f32 0.5, %v810_v50  ;;  %v717_v58 = vmul.f32 0.70710677, %v2868_v12  ;;  %v2876_v59 = vadd.f32 %v631_v56, %v2766_v4  ;;  %1538 = vmatmul.mubr.bf16.gmra.mrb[4].mxu1 %v1982_v42  ;;  %v908_v62 = vmul.f32 %v858_v48, %v2825_v39 }
 0x196   : > { %v861_v60 = vmul.f32 0.5, %v811_v52  ;;  %2260 = verf.f32 %v716_v53  ;;  %v718_v61 = vmul.f32 0.70710677, %v2872_v55  ;;  %v909_v9 = vmul.f32 %v859_v51, %v2828_v20 }
 0x197   : > { %v910_v1 = vmul.f32 %v860_v57, %v2832_v47  ;;  %2262 = verf.f32 %v717_v58  ;;  %v719_v7 = vmul.f32 0.70710677, %v2876_v59 }
 0x198   : > { %v2253_v6 = vpop.eup %2252  ;;  %v911_v10 = vmul.f32 %v861_v60, %v2836_v54  ;;  %2264 = verf.f32 %v718_v61 }
 0x199   : > { %v2255_v11 = vpop.eup %2254  ;;  %v812_v45 = vadd.f32 1.0, %v2253_v6  ;;  %2266 = verf.f32 %v719_v7  ;;  %v635_v8 = vpop.f32.mrb[28].mxu0  ;;  %v1984_v13 = vpack.c.bf16 %v910_v1, %v908_v62 }
 0x19a   : > { %v2257_v14 = vpop.eup %2256  ;;  %v813_v15 = vadd.f32 1.0, %v2255_v11  ;;  %v2885_v39 = vadd.f32 %v635_v8, %v2762_v3  ;;  %v637_v47 = vpop.f32.mrb[29].mxu0  ;;  %v1985_v40 = vpack.c.bf16 %v911_v10, %v909_v9 }
 0x19b   : > { %v2259_v49 = vpop.eup %2258  ;;  %v862_v19 = vmul.f32 0.5, %v812_v45  ;;  %v814_v21 = vadd.f32 1.0, %v2257_v14  ;;  %v2888_v20 = vadd.f32 %v637_v47, %v2766_v4  ;;  %v639_v54 = vpop.f32.mrb[30].mxu0 }
 0x19c   : > { %v863_v25 = vmul.f32 0.5, %v813_v15  ;;  %v815_v27 = vadd.f32 1.0, %v2259_v49  ;;  %v720_v28 = vmul.f32 0.70710677, %v2885_v39  ;;  %v2892_v30 = vadd.f32 %v639_v54, %v2762_v3  ;;  %v641_v31 = vpop.f32.mrb[31].mxu0  ;;  %1547 = vmatprep.mubr.bf16.mxu1 %v1985_v40 }
 0x19d   : > { %v864_v32 = vmul.f32 0.5, %v814_v21  ;;  %v721_v33 = vmul.f32 0.70710677, %v2888_v20  ;;  %v2896_v34 = vadd.f32 %v641_v31, %v2766_v4  ;;  %1548 = vmatmul.mubr.bf16.gmra.mrb[8].mxu1 %v1984_v13  ;;  %v912_v38 = vmul.f32 %v862_v19, %v2845_v35 }
 0x19e   : > { %v865_v36 = vmul.f32 0.5, %v815_v27  ;;  %2268 = verf.f32 %v720_v28  ;;  %v722_v37 = vmul.f32 0.70710677, %v2892_v30  ;;  %v913_v42 = vmul.f32 %v863_v25, %v2848_v17 }
 0x19f   : > { %v914_v18 = vmul.f32 %v864_v32, %v2852_v24  ;;  %2270 = verf.f32 %v721_v33  ;;  %v723_v23 = vmul.f32 0.70710677, %v2896_v34 }
 0x1a0   : > { %v2261_v41 = vpop.eup %2260  ;;  %v915_v43 = vmul.f32 %v865_v36, %v2856_v29  ;;  %2272 = verf.f32 %v722_v37 }
 0x1a1   : > { %v2263_v44 = vpop.eup %2262  ;;  %v816_v16 = vadd.f32 1.0, %v2261_v41  ;;  %2274 = verf.f32 %v723_v23  ;;  %v645_v26 = vpop.f32.mrb[32].mxu0  ;;  %v1986_v46 = vpack.c.bf16 %v914_v18, %v912_v38 }
 0x1a2   : > { %v2265_v48 = vpop.eup %2264  ;;  %v817_v50 = vadd.f32 1.0, %v2263_v44  ;;  %v2905_v35 = vadd.f32 %v645_v26, %v2762_v3  ;;  %v647_v24 = vpop.f32.mrb[33].mxu0  ;;  %v1987_v22 = vpack.c.bf16 %v915_v43, %v913_v42 }
 0x1a3   : > { %v2267_v51 = vpop.eup %2266  ;;  %v866_v52 = vmul.f32 0.5, %v816_v16  ;;  %v818_v53 = vadd.f32 1.0, %v2265_v48  ;;  %v2908_v17 = vadd.f32 %v647_v24, %v2766_v4  ;;  %v649_v29 = vpop.f32.mrb[34].mxu0 }
 0x1a4   : > { %v867_v56 = vmul.f32 0.5, %v817_v50  ;;  %v819_v57 = vadd.f32 1.0, %v2267_v51  ;;  %v724_v58 = vmul.f32 0.70710677, %v2905_v35  ;;  %v2912_v60 = vadd.f32 %v649_v29, %v2762_v3  ;;  %v651_v61 = vpop.f32.mrb[35].mxu0  ;;  %1557 = vmatprep.mubr.bf16.mxu1 %v1987_v22 }
 0x1a5   : > { %v868_v62 = vmul.f32 0.5, %v818_v53  ;;  %v725_v1 = vmul.f32 0.70710677, %v2908_v17  ;;  %v2916_v7 = vadd.f32 %v651_v61, %v2766_v4  ;;  %1558 = vmatmul.mubr.bf16.gmra.mrb[12].mxu1 %v1986_v46  ;;  %v916_v10 = vmul.f32 %v866_v52, %v2865_v5 }
 0x1a6   : > { %v869_v6 = vmul.f32 0.5, %v819_v57  ;;  %2276 = verf.f32 %v724_v58  ;;  %v726_v9 = vmul.f32 0.70710677, %v2912_v60  ;;  %v917_v13 = vmul.f32 %v867_v56, %v2868_v12 }
 0x1a7   : > { %v918_v11 = vmul.f32 %v868_v62, %v2872_v55  ;;  %2278 = verf.f32 %v725_v1  ;;  %v727_v45 = vmul.f32 0.70710677, %v2916_v7 }
 0x1a8   : > { %v2269_v8 = vpop.eup %2268  ;;  %v919_v14 = vmul.f32 %v869_v6, %v2876_v59  ;;  %2280 = verf.f32 %v726_v9 }
 0x1a9   : > { %v2271_v15 = vpop.eup %2270  ;;  %v820_v47 = vadd.f32 1.0, %v2269_v8  ;;  %2282 = verf.f32 %v727_v45  ;;  %v655_v40 = vpop.f32.mrb[36].mxu0  ;;  %v1988_v49 = vpack.c.bf16 %v918_v11, %v916_v10 }
 0x1aa   : > { %v2273_v19 = vpop.eup %2272  ;;  %v821_v21 = vadd.f32 1.0, %v2271_v15  ;;  %v2925_v5 = vadd.f32 %v655_v40, %v2762_v3  ;;  %v657_v55 = vpop.f32.mrb[37].mxu0  ;;  %v1989_v54 = vpack.c.bf16 %v919_v14, %v917_v13 }
 0x1ab   : > { %v2275_v25 = vpop.eup %2274  ;;  %v870_v27 = vmul.f32 0.5, %v820_v47  ;;  %v822_v28 = vadd.f32 1.0, %v2273_v19  ;;  %v2928_v12 = vadd.f32 %v657_v55, %v2766_v4  ;;  %v659_v59 = vpop.f32.mrb[38].mxu0 }
 0x1ac   : > { %v871_v31 = vmul.f32 0.5, %v821_v21  ;;  %v823_v32 = vadd.f32 1.0, %v2275_v25  ;;  %v728_v33 = vmul.f32 0.70710677, %v2925_v5  ;;  %v2932_v36 = vadd.f32 %v659_v59, %v2762_v3  ;;  %v661_v37 = vpop.f32.mrb[39].mxu0  ;;  %1567 = vmatprep.mubr.bf16.mxu1 %v1989_v54 }
 0x1ad   : > { %v872_v38 = vmul.f32 0.5, %v822_v28  ;;  %v729_v18 = vmul.f32 0.70710677, %v2928_v12  ;;  %v2936_v23 = vadd.f32 %v661_v37, %v2766_v4  ;;  %1568 = vmatmul.mubr.bf16.gmra.mrb[16].mxu1 %v1988_v49  ;;  %v920_v43 = vmul.f32 %v870_v27, %v2885_v39 }
 0x1ae   : > { %v873_v41 = vmul.f32 0.5, %v823_v32  ;;  %2284 = verf.f32 %v728_v33  ;;  %v730_v42 = vmul.f32 0.70710677, %v2932_v36  ;;  %v921_v46 = vmul.f32 %v871_v31, %v2888_v20 }
 0x1af   : > { %v922_v44 = vmul.f32 %v872_v38, %v2892_v30  ;;  %2286 = verf.f32 %v729_v18  ;;  %v731_v16 = vmul.f32 0.70710677, %v2936_v23 }
 0x1b0   : > { %v2277_v26 = vpop.eup %2276  ;;  %v923_v48 = vmul.f32 %v873_v41, %v2896_v34  ;;  %2288 = verf.f32 %v730_v42 }
 0x1b1   : > { %v2279_v50 = vpop.eup %2278  ;;  %v824_v24 = vadd.f32 1.0, %v2277_v26  ;;  %2290 = verf.f32 %v731_v16  ;;  %v665_v22 = vpop.f32.mrb[40].mxu0  ;;  %v1990_v51 = vpack.c.bf16 %v922_v44, %v920_v43 }
 0x1b2   : > { %v2281_v52 = vpop.eup %2280  ;;  %v825_v53 = vadd.f32 1.0, %v2279_v50  ;;  %v2945_v39 = vadd.f32 %v665_v22, %v2762_v3  ;;  %v667_v30 = vpop.f32.mrb[41].mxu0  ;;  %v1991_v29 = vpack.c.bf16 %v923_v48, %v921_v46 }
 0x1b3   : > { %v2283_v56 = vpop.eup %2282  ;;  %v874_v57 = vmul.f32 0.5, %v824_v24  ;;  %v826_v58 = vadd.f32 1.0, %v2281_v52  ;;  %v2948_v20 = vadd.f32 %v667_v30, %v2766_v4  ;;  %v669_v34 = vpop.f32.mrb[42].mxu0 }
 0x1b4   : > { %v875_v61 = vmul.f32 0.5, %v825_v53  ;;  %v827_v62 = vadd.f32 1.0, %v2283_v56  ;;  %v732_v1 = vmul.f32 0.70710677, %v2945_v39  ;;  %v2952_v6 = vadd.f32 %v669_v34, %v2762_v3  ;;  %v671_v9 = vpop.f32.mrb[43].mxu0  ;;  %1577 = vmatprep.mubr.bf16.mxu1 %v1991_v29 }
 0x1b5   : > { %v876_v10 = vmul.f32 0.5, %v826_v58  ;;  %v733_v11 = vmul.f32 0.70710677, %v2948_v20  ;;  %v2956_v45 = vadd.f32 %v671_v9, %v2766_v4  ;;  %1578 = vmatmul.mubr.bf16.gmra.mrb[20].mxu1 %v1990_v51  ;;  %v924_v14 = vmul.f32 %v874_v57, %v2905_v35 }
 0x1b6   : > { %v877_v8 = vmul.f32 0.5, %v827_v62  ;;  %2292 = verf.f32 %v732_v1  ;;  %v734_v13 = vmul.f32 0.70710677, %v2952_v6  ;;  %v925_v49 = vmul.f32 %v875_v61, %v2908_v17 }
 0x1b7   : > { %v926_v15 = vmul.f32 %v876_v10, %v2912_v60  ;;  %2294 = verf.f32 %v733_v11  ;;  %v735_v47 = vmul.f32 0.70710677, %v2956_v45 }
 0x1b8   : > { %v2285_v40 = vpop.eup %2284  ;;  %v927_v19 = vmul.f32 %v877_v8, %v2916_v7  ;;  %2296 = verf.f32 %v734_v13 }
 0x1b9   : > { %v2287_v21 = vpop.eup %2286  ;;  %v828_v55 = vadd.f32 1.0, %v2285_v40  ;;  %2298 = verf.f32 %v735_v47  ;;  %v675_v54 = vpop.f32.mrb[44].mxu0  ;;  %v1992_v25 = vpack.c.bf16 %v926_v15, %v924_v14 }
 0x1ba   : > { %v2289_v27 = vpop.eup %2288  ;;  %v829_v28 = vadd.f32 1.0, %v2287_v21  ;;  %v2965_v35 = vadd.f32 %v675_v54, %v2762_v3  ;;  %v677_v60 = vpop.f32.mrb[45].mxu0  ;;  %v1993_v59 = vpack.c.bf16 %v927_v19, %v925_v49 }
 0x1bb   : > { %v2291_v31 = vpop.eup %2290  ;;  %v878_v32 = vmul.f32 0.5, %v828_v55  ;;  %v830_v33 = vadd.f32 1.0, %v2289_v27  ;;  %v2968_v17 = vadd.f32 %v677_v60, %v2766_v4  ;;  %v679_v7 = vpop.f32.mrb[46].mxu0 }
 0x1bc   : > { %v879_v37 = vmul.f32 0.5, %v829_v28  ;;  %v831_v38 = vadd.f32 1.0, %v2291_v31  ;;  %v736_v18 = vmul.f32 0.70710677, %v2965_v35  ;;  %v2972_v41 = vadd.f32 %v679_v7, %v2762_v3  ;;  %v681_v42 = vpop.f32.mrb[47].mxu0  ;;  %1587 = vmatprep.mubr.bf16.mxu1 %v1993_v59 }
 0x1bd   : > { %v880_v43 = vmul.f32 0.5, %v830_v33  ;;  %v737_v44 = vmul.f32 0.70710677, %v2968_v17  ;;  %v2976_v16 = vadd.f32 %v681_v42, %v2766_v4  ;;  %1588 = vmatmul.mubr.bf16.gmra.mrb[24].mxu1 %v1992_v25  ;;  %v928_v48 = vmul.f32 %v878_v32, %v2925_v5 }
 0x1be   : > { %v881_v26 = vmul.f32 0.5, %v831_v38  ;;  %2300 = verf.f32 %v736_v18  ;;  %v738_v46 = vmul.f32 0.70710677, %v2972_v41  ;;  %v929_v51 = vmul.f32 %v879_v37, %v2928_v12 }
 0x1bf   : > { %v930_v50 = vmul.f32 %v880_v43, %v2932_v36  ;;  %2302 = verf.f32 %v737_v44  ;;  %v739_v24 = vmul.f32 0.70710677, %v2976_v16 }
 0x1c0   : > { %v2293_v22 = vpop.eup %2292  ;;  %v931_v52 = vmul.f32 %v881_v26, %v2936_v23  ;;  %2304 = verf.f32 %v738_v46 }
 0x1c1   : > { %v2295_v53 = vpop.eup %2294  ;;  %v832_v30 = vadd.f32 1.0, %v2293_v22  ;;  %2306 = verf.f32 %v739_v24  ;;  %v685_v29 = vpop.f32.mrb[48].mxu0  ;;  %v1994_v56 = vpack.c.bf16 %v930_v50, %v928_v48 }
 0x1c2   : > { %v2297_v57 = vpop.eup %2296  ;;  %v833_v58 = vadd.f32 1.0, %v2295_v53  ;;  %v686_v5 = vadd.f32 %v685_v29, %v2762_v3  ;;  %v687_v34 = vpop.f32.mrb[49].mxu0  ;;  %v1995_v36 = vpack.c.bf16 %v931_v52, %v929_v51 }
 0x1c3   : > { %v2299_v61 = vpop.eup %2298  ;;  %v882_v62 = vmul.f32 0.5, %v832_v30  ;;  %v834_v1 = vadd.f32 1.0, %v2297_v57  ;;  %v688_v9 = vadd.f32 %v687_v34, %v2766_v4  ;;  %v689_v12 = vpop.f32.mrb[50].mxu0 }
 0x1c4   : > { %v883_v10 = vmul.f32 0.5, %v833_v58  ;;  %v835_v23 = vadd.f32 1.0, %v2299_v61  ;;  %v740_v11 = vmul.f32 0.70710677, %v686_v5  ;;  %v690_v8 = vpop.f32.mrb[51].mxu0  ;;  %1597 = vmatprep.mubr.bf16.mxu1 %v1995_v36 }
 0x1c5   : > { %v884_v13 = vmul.f32 0.5, %v834_v1  ;;  %v741_v14 = vmul.f32 0.70710677, %v688_v9  ;;  %1598 = vmatmul.mubr.bf16.gmra.mrb[28].mxu1 %v1994_v56  ;;  %v932_v3 = vmul.f32 %v882_v62, %v2945_v39 }
 0x1c6   : > { %v885_v15 = vmul.f32 0.5, %v835_v23  ;;  %2308 = verf.f32 %v740_v11  ;;  %v933_v49 = vmul.f32 %v883_v10, %v2948_v20 }
 0x1c7   : > { %v934_v47 = vmul.f32 %v884_v13, %v2952_v6  ;;  %2310 = verf.f32 %v741_v14 }
 0x1c8   : > { %v2301_v40 = vpop.eup %2300  ;;  %v935_v4 = vmul.f32 %v885_v15, %v2956_v45 }
 0x1c9   : > { %v2303_v19 = vpop.eup %2302  ;;  %v836_v21 = vadd.f32 1.0, %v2301_v40  ;;  %v1996_v55 = vpack.c.bf16 %v934_v47, %v932_v3 }
 0x1ca   : > { %v2305_v54 = vpop.eup %2304  ;;  %v837_v25 = vadd.f32 1.0, %v2303_v19  ;;  %v1997_v27 = vpack.c.bf16 %v935_v4, %v933_v49 }
 0x1cb   : > { %v2307_v28 = vpop.eup %2306  ;;  %v886_v60 = vmul.f32 0.5, %v836_v21  ;;  %v838_v59 = vadd.f32 1.0, %v2305_v54 }
 0x1cc   : > { %v887_v31 = vmul.f32 0.5, %v837_v25  ;;  %v839_v32 = vadd.f32 1.0, %v2307_v28  ;;  %1607 = vmatprep.mubr.bf16.mxu1 %v1997_v27 }
 0x1cd   : > { %v888_v39 = vmul.f32 0.5, %v838_v59  ;;  %1608 = vmatmul.mubr.bf16.gmra.mrb[32].mxu1 %v1996_v55  ;;  %v936_v33 = vmul.f32 %v886_v60, %v2965_v35 }
 0x1ce   : > { %v889_v6 = vmul.f32 0.5, %v839_v32  ;;  %v937_v7 = vmul.f32 %v887_v31, %v2968_v17  ;;  %v1176_v17 = vld [vmem:[%s3168_s4] sm:$0x3] }
 0x1cf   : > { %v938_v20 = vmul.f32 %v888_v39, %v2972_v41  ;;  %v3004_v24 = vrot.slane %v1176_v17, %v371_v2 }
 0x1d0   : > { %v2309_v45 = vpop.eup %2308  ;;  %v939_v37 = vmul.f32 %v889_v6, %v2976_v16  ;;  %v3000_v16 = vrot.slane %v1176_v17, %v367_v0 }
 0x1d1   : > { %v2311_v38 = vpop.eup %2310  ;;  %v840_v18 = vadd.f32 1.0, %v2309_v45  ;;  %v1998_v42 = vpack.c.bf16 %v938_v20, %v936_v33 }
 0x1d2   : > { %v841_v43 = vadd.f32 1.0, %v2311_v38  ;;  %v1999_v44 = vpack.c.bf16 %v939_v37, %v937_v7 }
 0x1d3   : > { %v890_v26 = vmul.f32 0.5, %v840_v18 }
 0x1d4   : > { %v891_v46 = vmul.f32 0.5, %v841_v43  ;;  %1617 = vmatprep.mubr.bf16.mxu1 %v1999_v44 }
 0x1d5   : > { %1618 = vmatmul.mubr.bf16.gmra.mrb[36].mxu1 %v1998_v42  ;;  %v940_v50 = vmul.f32 %v890_v26, %v686_v5 }
 0x1d6   : > { %v941_v48 = vmul.f32 %v891_v46, %v688_v9 }
 0x1d7   : > { %v2000_v41 = vpack.c.bf16 %v940_v50, %v940_v50 }
 0x1d8   : > { %v2001_v35 = vpack.c.bf16 %v941_v48, %v941_v48 }
 0x1da   : > { %1627 = vmatprep.mubr.bf16.mxu1 %v2001_v35 }
 0x1dd   : > { %1628 = vmatmul.mubr.bf16.gmra.mrb[40].mxu1 %v2000_v41 }
 0x250   : > { %v1509_v22 = vpop.f32.mrb[52].mxu0 }
 0x251   : > { %v1510_v51 = vadd.f32 %v1509_v22, %v3000_v16  ;;  %v1511_v52 = vpop.f32.mrb[53].mxu0 }
 0x252   : > { %v1512_v53 = vadd.f32 %v1511_v52, %v3004_v24  ;;  %v1513_v30 = vpop.f32.mrb[54].mxu0 }
 0x253   : > { %1636 = vst [vmem:[%s3008_s9] sm:$0xff] %v1510_v51  ;;  %v1514_v63 = vadd.f32 %v1513_v30, %v3000_v16  ;;  %v1515_v0 = vpop.f32.mrb[55].mxu0 }
 0x254   : > { %1637 = vst [vmem:[%s3008_s9 + $0x8] sm:$0xff] %v1512_v53  ;;  %v1516_v2 = vadd.f32 %v1515_v0, %v3004_v24 }
 0x255   : > { %1638 = vst [vmem:[%s3008_s9 + $0x10] sm:$0xff] %v1514_v63 }
 0x256   : > { %1639 = vst [vmem:[%s3008_s9 + $0x18] sm:$0xff] %v1516_v2 }
 0x258   : > { %v1519_v29 = vpop.f32.mrb[56].mxu0 }
 0x259   : > { %v1520_v56 = vadd.f32 %v1519_v29, %v3000_v16  ;;  %v1521_v57 = vpop.f32.mrb[57].mxu0 }
 0x25a   : > { %v1522_v58 = vadd.f32 %v1521_v57, %v3004_v24  ;;  %v1523_v5 = vpop.f32.mrb[58].mxu0 }
 0x25b   : > { %1640 = vst [vmem:[%s3008_s9 + $0x20] sm:$0xff] %v1520_v56  ;;  %v1524_v34 = vadd.f32 %v1523_v5, %v3000_v16  ;;  %v1525_v36 = vpop.f32.mrb[59].mxu0 }
 0x25c   : > { %1641 = vst [vmem:[%s3008_s9 + $0x28] sm:$0xff] %v1522_v58  ;;  %v1526_v61 = vadd.f32 %v1525_v36, %v3004_v24 }
 0x25d   : > { %1642 = vst [vmem:[%s3008_s9 + $0x30] sm:$0xff] %v1524_v34 }
 0x25e   : > { %1643 = vst [vmem:[%s3008_s9 + $0x38] sm:$0xff] %v1526_v61 }
 0x260   : > { %v1529_v62 = vpop.f32.mrb[0].mxu1 }
 0x261   : > { %v1530_v1 = vadd.f32 %v1529_v62, %v3000_v16  ;;  %v1531_v9 = vpop.f32.mrb[1].mxu1 }
 0x262   : > { %v1532_v12 = vadd.f32 %v1531_v9, %v3004_v24  ;;  %v1533_v10 = vpop.f32.mrb[2].mxu1 }
 0x263   : > { %1644 = vst [vmem:[%s3008_s9 + $0x40] sm:$0xff] %v1530_v1  ;;  %v1534_v23 = vadd.f32 %v1533_v10, %v3000_v16  ;;  %v1535_v11 = vpop.f32.mrb[3].mxu1 }
 0x264   : > { %1645 = vst [vmem:[%s3008_s9 + $0x48] sm:$0xff] %v1532_v12  ;;  %v1536_v8 = vadd.f32 %v1535_v11, %v3004_v24 }
 0x265   : > { %1646 = vst [vmem:[%s3008_s9 + $0x50] sm:$0xff] %v1534_v23 }
 0x266   : > { %1647 = vst [vmem:[%s3008_s9 + $0x58] sm:$0xff] %v1536_v8 }
 0x268   : > { %v1539_v13 = vpop.f32.mrb[4].mxu1 }
 0x269   : > { %v1540_v14 = vadd.f32 %v1539_v13, %v3000_v16  ;;  %v1541_v15 = vpop.f32.mrb[5].mxu1 }
 0x26a   : > { %v1542_v3 = vadd.f32 %v1541_v15, %v3004_v24  ;;  %v1543_v47 = vpop.f32.mrb[6].mxu1 }
 0x26b   : > { %1648 = vst [vmem:[%s3008_s9 + $0x60] sm:$0xff] %v1540_v14  ;;  %v1544_v40 = vadd.f32 %v1543_v47, %v3000_v16  ;;  %v1545_v49 = vpop.f32.mrb[7].mxu1 }
 0x26c   : > { %1649 = vst [vmem:[%s3008_s9 + $0x68] sm:$0xff] %v1542_v3  ;;  %v1546_v4 = vadd.f32 %v1545_v49, %v3004_v24 }
 0x26d   : > { %1650 = vst [vmem:[%s3008_s9 + $0x70] sm:$0xff] %v1544_v40 }
 0x26e   : > { %1651 = vst [vmem:[%s3008_s9 + $0x78] sm:$0xff] %v1546_v4 }
 0x270   : > { %v1549_v19 = vpop.f32.mrb[8].mxu1 }
 0x271   : > { %v1550_v21 = vadd.f32 %v1549_v19, %v3000_v16  ;;  %v1551_v55 = vpop.f32.mrb[9].mxu1 }
 0x272   : > { %v1552_v54 = vadd.f32 %v1551_v55, %v3004_v24  ;;  %v1553_v25 = vpop.f32.mrb[10].mxu1 }
 0x273   : > { %1652 = vst [vmem:[%s3008_s9 + $0x80] sm:$0xff] %v1550_v21  ;;  %v1554_v27 = vadd.f32 %v1553_v25, %v3000_v16  ;;  %v1555_v28 = vpop.f32.mrb[11].mxu1 }
 0x274   : > { %1653 = vst [vmem:[%s3008_s9 + $0x88] sm:$0xff] %v1552_v54  ;;  %v1556_v60 = vadd.f32 %v1555_v28, %v3004_v24 }
 0x275   : > { %1654 = vst [vmem:[%s3008_s9 + $0x90] sm:$0xff] %v1554_v27 }
 0x276   : > { %1655 = vst [vmem:[%s3008_s9 + $0x98] sm:$0xff] %v1556_v60 }
 0x278   : > { %v1559_v59 = vpop.f32.mrb[12].mxu1 }
 0x279   : > { %v1560_v31 = vadd.f32 %v1559_v59, %v3000_v16  ;;  %v1561_v32 = vpop.f32.mrb[13].mxu1 }
 0x27a   : > { %v1562_v39 = vadd.f32 %v1561_v32, %v3004_v24  ;;  %v1563_v6 = vpop.f32.mrb[14].mxu1 }
 0x27b   : > { %1656 = vst [vmem:[%s3008_s9 + $0xa0] sm:$0xff] %v1560_v31  ;;  %v1564_v33 = vadd.f32 %v1563_v6, %v3000_v16  ;;  %v1565_v20 = vpop.f32.mrb[15].mxu1 }
 0x27c   : > { %1657 = vst [vmem:[%s3008_s9 + $0xa8] sm:$0xff] %v1562_v39  ;;  %v1566_v45 = vadd.f32 %v1565_v20, %v3004_v24 }
 0x27d   : > { %1658 = vst [vmem:[%s3008_s9 + $0xb0] sm:$0xff] %v1564_v33 }
 0x27e   : > { %1659 = vst [vmem:[%s3008_s9 + $0xb8] sm:$0xff] %v1566_v45 }
 0x280   : > { %v1569_v7 = vpop.f32.mrb[16].mxu1 }
 0x281   : > { %v1570_v37 = vadd.f32 %v1569_v7, %v3000_v16  ;;  %v1571_v38 = vpop.f32.mrb[17].mxu1 }
 0x282   : > { %v1572_v18 = vadd.f32 %v1571_v38, %v3004_v24  ;;  %v1573_v42 = vpop.f32.mrb[18].mxu1 }
 0x283   : > { %1660 = vst [vmem:[%s3008_s9 + $0xc0] sm:$0xff] %v1570_v37  ;;  %v1574_v43 = vadd.f32 %v1573_v42, %v3000_v16  ;;  %v1575_v44 = vpop.f32.mrb[19].mxu1 }
 0x284   : > { %1661 = vst [vmem:[%s3008_s9 + $0xc8] sm:$0xff] %v1572_v18  ;;  %v1576_v26 = vadd.f32 %v1575_v44, %v3004_v24 }
 0x285   : > { %1662 = vst [vmem:[%s3008_s9 + $0xd0] sm:$0xff] %v1574_v43 }
 0x286   : > { %1663 = vst [vmem:[%s3008_s9 + $0xd8] sm:$0xff] %v1576_v26 }
 0x288   : > { %v1579_v46 = vpop.f32.mrb[20].mxu1 }
 0x289   : > { %v1580_v48 = vadd.f32 %v1579_v46, %v3000_v16  ;;  %v1581_v50 = vpop.f32.mrb[21].mxu1 }
 0x28a   : > { %v1582_v35 = vadd.f32 %v1581_v50, %v3004_v24  ;;  %v1583_v41 = vpop.f32.mrb[22].mxu1 }
 0x28b   : > { %1664 = vst [vmem:[%s3008_s9 + $0xe0] sm:$0xff] %v1580_v48  ;;  %v1584_v17 = vadd.f32 %v1583_v41, %v3000_v16  ;;  %v1585_v22 = vpop.f32.mrb[23].mxu1 }
 0x28c   : > { %1665 = vst [vmem:[%s3008_s9 + $0xe8] sm:$0xff] %v1582_v35  ;;  %v1586_v51 = vadd.f32 %v1585_v22, %v3004_v24 }
 0x28d   : > { %1666 = vst [vmem:[%s3008_s9 + $0xf0] sm:$0xff] %v1584_v17 }
 0x28e   : > { %1667 = vst [vmem:[%s3008_s9 + $0xf8] sm:$0xff] %v1586_v51 }
 0x290   : > { %v1589_v52 = vpop.f32.mrb[24].mxu1 }
 0x291   : > { %v1590_v53 = vadd.f32 %v1589_v52, %v3000_v16  ;;  %v1591_v30 = vpop.f32.mrb[25].mxu1 }
 0x292   : > { %v1592_v63 = vadd.f32 %v1591_v30, %v3004_v24  ;;  %v1593_v0 = vpop.f32.mrb[26].mxu1 }
 0x293   : > { %1668 = vst [vmem:[%s3008_s9 + $0x100] sm:$0xff] %v1590_v53  ;;  %v1594_v2 = vadd.f32 %v1593_v0, %v3000_v16  ;;  %v1595_v29 = vpop.f32.mrb[27].mxu1 }
 0x294   : > { %1669 = vst [vmem:[%s3008_s9 + $0x108] sm:$0xff] %v1592_v63  ;;  %v1596_v56 = vadd.f32 %v1595_v29, %v3004_v24 }
 0x295   : > { %1670 = vst [vmem:[%s3008_s9 + $0x110] sm:$0xff] %v1594_v2 }
 0x296   : > { %1671 = vst [vmem:[%s3008_s9 + $0x118] sm:$0xff] %v1596_v56 }
 0x298   : > { %v1599_v57 = vpop.f32.mrb[28].mxu1 }
 0x299   : > { %v1600_v58 = vadd.f32 %v1599_v57, %v3000_v16  ;;  %v1601_v5 = vpop.f32.mrb[29].mxu1 }
 0x29a   : > { %v1602_v34 = vadd.f32 %v1601_v5, %v3004_v24  ;;  %v1603_v36 = vpop.f32.mrb[30].mxu1 }
 0x29b   : > { %1672 = vst [vmem:[%s3008_s9 + $0x120] sm:$0xff] %v1600_v58  ;;  %v1604_v61 = vadd.f32 %v1603_v36, %v3000_v16  ;;  %v1605_v62 = vpop.f32.mrb[31].mxu1 }
 0x29c   : > { %1673 = vst [vmem:[%s3008_s9 + $0x128] sm:$0xff] %v1602_v34  ;;  %v1606_v1 = vadd.f32 %v1605_v62, %v3004_v24 }
 0x29d   : > { %1674 = vst [vmem:[%s3008_s9 + $0x130] sm:$0xff] %v1604_v61 }
 0x29e   : > { %1675 = vst [vmem:[%s3008_s9 + $0x138] sm:$0xff] %v1606_v1 }
 0x2a0   : > { %v1609_v9 = vpop.f32.mrb[32].mxu1 }
 0x2a1   : > { %v1610_v12 = vadd.f32 %v1609_v9, %v3000_v16  ;;  %v1611_v10 = vpop.f32.mrb[33].mxu1 }
 0x2a2   : > { %v1612_v23 = vadd.f32 %v1611_v10, %v3004_v24  ;;  %v1613_v11 = vpop.f32.mrb[34].mxu1 }
 0x2a3   : > { %1676 = vst [vmem:[%s3008_s9 + $0x140] sm:$0xff] %v1610_v12  ;;  %v1614_v8 = vadd.f32 %v1613_v11, %v3000_v16  ;;  %v1615_v13 = vpop.f32.mrb[35].mxu1 }
 0x2a4   : > { %1677 = vst [vmem:[%s3008_s9 + $0x148] sm:$0xff] %v1612_v23  ;;  %v1616_v14 = vadd.f32 %v1615_v13, %v3004_v24 }
 0x2a5   : > { %1678 = vst [vmem:[%s3008_s9 + $0x150] sm:$0xff] %v1614_v8 }
 0x2a6   : > { %1679 = vst [vmem:[%s3008_s9 + $0x158] sm:$0xff] %v1616_v14 }
 0x2a8   : > { %v1619_v15 = vpop.f32.mrb[36].mxu1 }
 0x2a9   : > { %v1620_v3 = vadd.f32 %v1619_v15, %v3000_v16  ;;  %v1621_v47 = vpop.f32.mrb[37].mxu1 }
 0x2aa   : > { %v1622_v40 = vadd.f32 %v1621_v47, %v3004_v24  ;;  %v1623_v49 = vpop.f32.mrb[38].mxu1 }
 0x2ab   : > { %1680 = vst [vmem:[%s3008_s9 + $0x160] sm:$0xff] %v1620_v3  ;;  %v1624_v4 = vadd.f32 %v1623_v49, %v3000_v16  ;;  %v1625_v19 = vpop.f32.mrb[39].mxu1 }
 0x2ac   : > { %1681 = vst [vmem:[%s3008_s9 + $0x168] sm:$0xff] %v1622_v40  ;;  %v1626_v21 = vadd.f32 %v1625_v19, %v3004_v24 }
 0x2ad   : > { %1682 = vst [vmem:[%s3008_s9 + $0x170] sm:$0xff] %v1624_v4 }
 0x2ae   : > { %1683 = vst [vmem:[%s3008_s9 + $0x178] sm:$0xff] %v1626_v21 }
 0x2b0   : > { %v1629_v55 = vpop.f32.mrb[40].mxu1 }
 0x2b1   : > { %v1630_v54 = vadd.f32 %v1629_v55, %v3000_v16  ;;  %v1631_v25 = vpop.f32.mrb[41].mxu1 }
 0x2b2   : > { %v1632_v27 = vadd.f32 %v1631_v25, %v3004_v24  ;;  %v1633_v28 = vpop.f32.mrb[42].mxu1 }
 0x2b3   : > { %1684 = vst [vmem:[%s3008_s9 + $0x180] sm:$0xff] %v1630_v54  ;;  %v1634_v60 = vpop.f32.mrb[43].mxu1 }
 0x2b4   : > { %1685 = vst [vmem:[%s3008_s9 + $0x188] sm:$0xff] %v1632_v27 }
 0x2b5   : > { %2411 = shalt.err (!%p2408_p2)
}
 0x2b6   : > { %s2412_s28 = scalar_lea.hbm %s3110_s16, 6400  ;;  %s2416_s24 = scalar_lea.hbm %s3169_s5, 12800 }
 0x2b7   : > { %p2413_p0 = scmp.ne.s32.totalorder %s3110_s16, %s2412_s28  ;;  %p2417_p6 = scmp.lt.u32.totalorder %s3110_s16, %s3169_s5 }
 0x2b8   : > { %p2418_p7 = scmp.lt.u32.totalorder %s2416_s24, %s2412_s28  ;;  %p2420_p8 = scmp.lt.u32.totalorder %s2412_s28, %s3110_s16 }
 0x2b9   : > { %p2414_p4 = pnand %p2413_p0, %p3184_p12 }
 0x2ba   : > { %p2419_p11 = por %p2418_p7, %p2417_p6 }
 0x2bb   : > { %p2415_p13 = pneg %p2414_p4 }
 0x2bc   : > { %p2421_p1 = por %p2420_p8, %p2419_p11 }
 0x2be   : > { %p2422_p10 = pnand %p2421_p1, %p2415_p13 }
 0x2c0   : > { %2425 = shalt.err (!%p2422_p10)
}
 0x2c1   : > { %s2495_s10 = smov 256   ;;  %s2496_s14 = smov 16  }
 0x2c2   : > { %2047 = dma.vmem_to_hbm [thread:$0]  (%p3184_p12), %s3112_s13, 6400, %s3110_s16, %s1687_s21, %s2495_s10, %s2495_s10, %s2496_s14  }
 0x2c3 PF: > { %s1718_s27 = sand.u32 1, %s2464_s18   ;;  %p3185_p3 = scmp.ne.s32.totalorder %s3177_s29, 0 }
 0x2c4   : > { %p3186_p5 = scmp.ge.s32.totalorder %s2484_s23, 2  ;;  %s1719_s15 = scalar_lea.sflag [#allocation5], %s1718_s27 }
 0x2c6   : > { %p2061_p9 = pnand %p3186_p5, %p3185_p3 }
 0x2c8   : > { %2459 = dma.done.wait (!%p2061_p9), %s1719_s15, 6400  }
 0x2c9   : > { %2461 = vsyncadd (!%p2061_p9), %s1719_s15, 4294960896  ;;  %s22_s23 = sadd.s32 1, %s2484_s23   ;;  %s3187_s18 = smov %s2468_s19 }
 0x2ca   : > { %p19_p2 = scmp.ge.s32.totalorder %s22_s23, 4   ;;  %s3188_s19 = smov %s2472_s20 }
 0x2cb   : > { %s3189_s20 = smov %s2672_s6  ;;  %s3190_s21 = smov %s2480_s22 }
 0x2cc   : > { %s3191_s22 = smov %s3193_s12  ;;  %21 = sbr.rel (!%p19_p2) target bundleno = 7 (0x7), region = 101 }
 0x2d3   :  { %1724 = vsyncpa [#allocation4], 1 }
 0x2d4   :  { %1726 = vsyncpa [#allocation4 + $0x1], 1 }
 0x2d5   :  { %1727 = vsyncpa [#allocation7], 1 }
 0x2d6   :  { %1728 = vsyncpa [#allocation5], 1 }
 0x2d7   :  { %1730 = vsyncpa [#allocation5 + $0x1], 1 }

</bundles_post_ra>
